<compile_context>
chip_gen: v7x
topology: tpu7x:2x2x1
jax: 0.10.0
libtpu: 0.0.40
codegen_flags: <defaults>
</compile_context>

<pallas_src>
import jax
import jax.numpy as jnp
from jax.experimental import pallas as pl
from jax.experimental.pallas import tpu as pltpu

# ----------------------------- config (small, synthetic) ------------------------------
B = 2              # batch
N = 8              # num_nodes / sequence length
D = 32             # input_dim == hidden_dim
H = 4              # num_heads
P = D // H         # head_dim
MLP_HIDDEN = 64    # hidden_dim * mlp_hidden_multiplier (2)
NUM_LAYERS = 2
HEAD_HIDDEN = 32   # head BasicMLP hidden size
N_CLASSES = 3
LN_EPS = 1e-5      # nn.LayerNorm default
SCALE = 1.0 / (P ** 0.5)
PAD_W = 3 * D      # lane width of the packed bias / LayerNorm-param slab rows


# ----------------------------------- shared helpers ------------------------------------
def _layernorm(t):
    mu = jnp.mean(t, axis=-1, keepdims=True)
    var = jnp.mean(jnp.square(t - mu), axis=-1, keepdims=True)
    return (t - mu) * jax.lax.rsqrt(var + LN_EPS)


def _mxu_dot(a, b):
    """Matmul with bf16 operands (MXU-native on v5e/v6e/v7x) and f32 accumulation."""
    return jnp.dot(a.astype(jnp.bfloat16), b.astype(jnp.bfloat16),
                   preferred_element_type=jnp.float32)


# ----------------------------------- Pallas kernel -------------------------------------
def transformer_kernel(
    x_ref,        # (B*N, D)            f32  tokens, batch flattened into rows
    wqkv_ref,     # (L, D, 3D)          bf16 fused [Wq | Wk | Wv] per layer
    w1_ref,       # (L, D, MLP_HIDDEN)  bf16 block-MLP first linear
    w2_ref,       # (L, MLP_HIDDEN, D)  bf16 block-MLP second linear
    vec_ref,      # (L, 7, PAD_W)       f32  [bqkv, b1, b2, ln1_g, ln1_b, ln2_g, ln2_b]
    hw1_ref,      # (D, HEAD_HIDDEN)    bf16 head linear 1
    hw2_ref,      # (HEAD_HIDDEN, C)    bf16 head linear 2
    hb_ref,       # (2, HEAD_HIDDEN)    f32  [head_b1, head_b2 (padded)]
    out_ref,      # (B, C)              f32  logits
    attn_ref,     # (B*N, D)            f32  VMEM scratch for per-head attention outputs
):
    f32 = jnp.float32
    bf16 = jnp.bfloat16

    xf = x_ref[...].astype(f32)          # (B*N, D)
    vecs = vec_ref[...]                  # (L, 7, PAD_W)

    for l in range(NUM_LAYERS):
        bqkv = vecs[l, 0:1, :3 * D]      # (1, 3D)
        b1   = vecs[l, 1:2, :MLP_HIDDEN]
        b2   = vecs[l, 2:3, :D]
        g1   = vecs[l, 3:4, :D]
        be1  = vecs[l, 4:5, :D]
        g2   = vecs[l, 5:6, :D]
        be2  = vecs[l, 6:7, :D]

        # ---- LayerNorm 1 (f32 elementwise) ----
        z1 = _layernorm(xf) * g1 + be1                              # (B*N, D)

        # ---- fused Q/K/V projection: single MXU matmul ----
        qkv = _mxu_dot(z1, wqkv_ref[l]) + bqkv                      # (B*N, 3D) f32

        # ---- multi-head attention: per head, batched over B ----
        for h in range(H):
            o = h * P
            qh = qkv[:, o:o + P].reshape(B, N, P).astype(bf16)
            kh = qkv[:, D + o:D + o + P].reshape(B, N, P).astype(bf16)
            vh = qkv[:, 2 * D + o:2 * D + o + P].reshape(B, N, P).astype(bf16)

            # scores: contract last dims (no explicit transpose)
            s = jnp.einsum('bqd,bkd->bqk', qh, kh,
                           preferred_element_type=f32) * SCALE      # (B, N, N)
            s = s - jnp.max(s, axis=-1, keepdims=True)
            e = jnp.exp(s)
            p = e * pl.reciprocal(jnp.sum(e, axis=-1, keepdims=True), approx=True)

            oh = jnp.einsum('bqk,bkd->bqd', p.astype(bf16), vh,
                            preferred_element_type=f32)             # (B, N, P)
            # write this head's output into its lane slice of the scratch (no concatenate)
            attn_ref[:, o:o + P] = oh.reshape(B * N, P)

        # ---- residual 1 ----
        s1 = xf + attn_ref[...]

        # ---- LayerNorm 2 + MLP (Linear -> ReLU -> Linear) ----
        z2 = _layernorm(s1) * g2 + be2
        hdn = jnp.maximum(_mxu_dot(z2, w1_ref[l]) + b1, 0.0)        # (B*N, MLP_HIDDEN)
        xf = s1 + _mxu_dot(hdn, w2_ref[l]) + b2                     # residual 2

    # ---- pooling = 'mean' over the node/sequence axis ----
    pooled = jnp.mean(xf.reshape(B, N, D), axis=1)                  # (B, D)

    # ---- classification head (BasicMLP: Linear -> ReLU -> Linear) ----
    hb = hb_ref[...]
    h1 = jnp.maximum(_mxu_dot(pooled, hw1_ref[...]) + hb[0:1, :], 0.0)
    logits = _mxu_dot(h1, hw2_ref[...]) + hb[1:2, :N_CLASSES]       # (B, C)
    out_ref[...] = logits.astype(out_ref.dtype)


# ------------------------------------- wrapper -----------------------------------------
@jax.jit
def transformer_forward(x, packed):
    wqkv, w1s, w2s, vec, hw1, hw2, hb = packed
    x_flat = x.reshape(B * N, D)   # flatten batch into rows: one 16-row DMA, no batch grid
    return pl.pallas_call(
        transformer_kernel,
        out_shape=jax.ShapeDtypeStruct((B, N_CLASSES), jnp.float32),
        scratch_shapes=[pltpu.VMEM((B * N, D), jnp.float32)],
    )(x_flat, wqkv, w1s, w2s, vec, hw1, hw2, hb)


# ---------------------------------- pure-JAX reference ----------------------------------
# Mirrors the kernel's mixed precision (bf16 matmul operands, f32 accumulation / elementwise)
# so the comparison isolates structural correctness; tolerance also absorbs the kernel's
# approximate-reciprocal softmax normalization.
def reference(x, layers, head):
    out = x.astype(jnp.float32)
    hw1, hb1, hw2, hb2 = head
    for (wq, bq, wk, bk, wv, bv, g1, be1, g2, be2, w1, b1, w2, b2) in layers:
        z1 = _layernorm(out) * g1 + be1
        q = (_mxu_dot(z1, wq) + bq).reshape(B, N, H, P)
        k = (_mxu_dot(z1, wk) + bk).reshape(B, N, H, P)
        v = (_mxu_dot(z1, wv) + bv).reshape(B, N, H, P)
        raw = jnp.einsum('bihd,bjhd->bhij',
                         q.astype(jnp.bfloat16), k.astype(jnp.bfloat16),
                         preferred_element_type=jnp.float32) * SCALE
        p = jax.nn.softmax(raw, axis=-1)
        attn = jnp.einsum('bhij,bjhp->bihp',
                          p.astype(jnp.bfloat16), v.astype(jnp.bfloat16),
                          preferred_element_type=jnp.float32).reshape(B, N, D)
        s1 = out + attn
        z2 = _layernorm(s1) * g2 + be2
        out = s1 + _mxu_dot(jnp.maximum(_mxu_dot(z2, w1) + b1, 0.0), w2) + b2
    pooled = out.mean(axis=1)
    h1 = jnp.maximum(_mxu_dot(pooled, hw1) + hb1, 0.0)
    return _mxu_dot(h1, hw2) + hb2


# --------------------------------------- main -------------------------------------------
if __name__ == "__main__":
    key_iter = iter(jax.random.split(jax.random.PRNGKey(0), 128))

    def nk():
        return next(key_iter)

    def init_linear(fan_in, fan_out):
        bound = 1.0 / (fan_in ** 0.5)     # nn.Linear default init (weights pre-transposed)
        w = jax.random.uniform(nk(), (fan_in, fan_out), jnp.float32, -bound, bound)
        b = jax.random.uniform(nk(), (fan_out,), jnp.float32, -bound, bound)
        return w, b

    layers = []
    for _ in range(NUM_LAYERS):
        wq, bq = init_linear(D, D)
        wk, bk = init_linear(D, D)
        wv, bv = init_linear(D, D)
        w1, b1 = init_linear(D, MLP_HIDDEN)
        w2, b2 = init_linear(MLP_HIDDEN, D)
        g1  = 1.0 + 0.1 * jax.random.normal(nk(), (D,), jnp.float32)
        be1 = 0.1 * jax.random.normal(nk(), (D,), jnp.float32)
        g2  = 1.0 + 0.1 * jax.random.normal(nk(), (D,), jnp.float32)
        be2 = 0.1 * jax.random.normal(nk(), (D,), jnp.float32)
        layers.append((wq, bq, wk, bk, wv, bv, g1, be1, g2, be2, w1, b1, w2, b2))

    hw1, hb1 = init_linear(D, HEAD_HIDDEN)
    hw2, hb2 = init_linear(HEAD_HIDDEN, N_CLASSES)

    x = jax.random.normal(nk(), (B, N, D), jnp.float32)

    # -------- pack parameters into a few slabs (fewer, larger DMAs; bf16 weights) --------
    def pad_row(v):
        return jnp.zeros((PAD_W,), jnp.float32).at[:v.shape[0]].set(v)

    wqkv = jnp.stack([jnp.concatenate([l[0], l[2], l[4]], axis=1)
                      for l in layers]).astype(jnp.bfloat16)              # (L, D, 3D)
    w1s = jnp.stack([l[10] for l in layers]).astype(jnp.bfloat16)         # (L, D, MLP_HIDDEN)
    w2s = jnp.stack([l[12] for l in layers]).astype(jnp.bfloat16)         # (L, MLP_HIDDEN, D)
    vec = jnp.stack([jnp.stack([pad_row(jnp.concatenate([l[1], l[3], l[5]])),  # bq|bk|bv
                                pad_row(l[11]),                               # b1
                                pad_row(l[13]),                               # b2
                                pad_row(l[6]), pad_row(l[7]),                 # ln1 g/b
                                pad_row(l[8]), pad_row(l[9])])                # ln2 g/b
                     for l in layers])                                    # (L, 7, PAD_W)
    hb = jnp.stack([hb1,
                    jnp.zeros((HEAD_HIDDEN,), jnp.float32).at[:N_CLASSES].set(hb2)])

    packed = (wqkv, w1s, w2s, vec,
              hw1.astype(jnp.bfloat16), hw2.astype(jnp.bfloat16), hb)

    out = transformer_forward(x, packed)
    out = jax.block_until_ready(out)

    ref = reference(x, layers, (hw1, hb1, hw2, hb2))
    assert out.shape == (B, N_CLASSES)
    # tolerance covers approx-reciprocal softmax + MXU/XLA accumulation-order differences
    assert jnp.allclose(out, ref, atol=2e-2, rtol=2e-2), "mismatch vs pure-JAX reference"

    print("KERNEL_OK")
</pallas_src>

<mosaic_0001>
module attributes {stable_mosaic.version = 11 : i64} {
  func.func @transformer_kernel(%arg0: memref<16x32xf32, #tpu.memory_space<vmem>>, %arg1: memref<2x32x96xbf16, #tpu.memory_space<vmem>>, %arg2: memref<2x32x64xbf16, #tpu.memory_space<vmem>>, %arg3: memref<2x64x32xbf16, #tpu.memory_space<vmem>>, %arg4: memref<2x7x96xf32, #tpu.memory_space<vmem>>, %arg5: memref<32x32xbf16, #tpu.memory_space<vmem>>, %arg6: memref<32x3xbf16, #tpu.memory_space<vmem>>, %arg7: memref<2x32xf32, #tpu.memory_space<vmem>>, %arg8: memref<2x3xf32, #tpu.memory_space<vmem>>, %arg9: memref<16x32xf32, #tpu.memory_space<vmem>>) attributes {dimension_semantics = [], scalar_prefetch = 0 : i64, scratch_operands = 1 : i64, tpu.core_type = #tpu.core_type<tc>} {
    %c0 = arith.constant 0 : index
    %c0_0 = arith.constant 0 : index
    %0 = vector.load %arg0[%c0, %c0_0] : memref<16x32xf32, #tpu.memory_space<vmem>>, vector<16x32xf32>
    %c0_1 = arith.constant 0 : index
    %c0_2 = arith.constant 0 : index
    %c0_3 = arith.constant 0 : index
    %1 = vector.load %arg4[%c0_1, %c0_2, %c0_3] : memref<2x7x96xf32, #tpu.memory_space<vmem>>, vector<2x7x96xf32>
    %2 = vector.extract_strided_slice %1 {offsets = [0, 0, 0], sizes = [1, 1, 96], strides = [1, 1, 1]} : vector<2x7x96xf32> to vector<1x1x96xf32>
    %3 = vector.shape_cast %2 : vector<1x1x96xf32> to vector<1x96xf32>
    %4 = vector.extract_strided_slice %1 {offsets = [0, 1, 0], sizes = [1, 1, 64], strides = [1, 1, 1]} : vector<2x7x96xf32> to vector<1x1x64xf32>
    %5 = vector.shape_cast %4 : vector<1x1x64xf32> to vector<1x64xf32>
    %6 = vector.extract_strided_slice %1 {offsets = [0, 2, 0], sizes = [1, 1, 32], strides = [1, 1, 1]} : vector<2x7x96xf32> to vector<1x1x32xf32>
    %7 = vector.shape_cast %6 : vector<1x1x32xf32> to vector<1x32xf32>
    %8 = vector.extract_strided_slice %1 {offsets = [0, 3, 0], sizes = [1, 1, 32], strides = [1, 1, 1]} : vector<2x7x96xf32> to vector<1x1x32xf32>
    %9 = vector.shape_cast %8 : vector<1x1x32xf32> to vector<1x32xf32>
    %10 = vector.extract_strided_slice %1 {offsets = [0, 4, 0], sizes = [1, 1, 32], strides = [1, 1, 1]} : vector<2x7x96xf32> to vector<1x1x32xf32>
    %11 = vector.shape_cast %10 : vector<1x1x32xf32> to vector<1x32xf32>
    %12 = vector.extract_strided_slice %1 {offsets = [0, 5, 0], sizes = [1, 1, 32], strides = [1, 1, 1]} : vector<2x7x96xf32> to vector<1x1x32xf32>
    %13 = vector.shape_cast %12 : vector<1x1x32xf32> to vector<1x32xf32>
    %14 = vector.extract_strided_slice %1 {offsets = [0, 6, 0], sizes = [1, 1, 32], strides = [1, 1, 1]} : vector<2x7x96xf32> to vector<1x1x32xf32>
    %15 = vector.shape_cast %14 : vector<1x1x32xf32> to vector<1x32xf32>
    %cst = arith.constant dense<0.000000e+00> : vector<16xf32>
    %16 = vector.multi_reduction <add>, %0, %cst [1] : vector<16x32xf32> to vector<16xf32>
    %17 = vector.shape_cast %16 : vector<16xf32> to vector<16x1xf32>
    %cst_4 = arith.constant 3.200000e+01 : f32
    %18 = vector.broadcast %cst_4 : f32 to vector<16x1xf32>
    %19 = arith.divf %17, %18 : vector<16x1xf32>
    %20 = vector.broadcast %19 : vector<16x1xf32> to vector<16x32xf32>
    %21 = arith.subf %0, %20 : vector<16x32xf32>
    %22 = arith.mulf %21, %21 : vector<16x32xf32>
    %cst_5 = arith.constant dense<0.000000e+00> : vector<16xf32>
    %23 = vector.multi_reduction <add>, %22, %cst_5 [1] : vector<16x32xf32> to vector<16xf32>
    %24 = vector.shape_cast %23 : vector<16xf32> to vector<16x1xf32>
    %cst_6 = arith.constant 3.200000e+01 : f32
    %25 = vector.broadcast %cst_6 : f32 to vector<16x1xf32>
    %26 = arith.divf %24, %25 : vector<16x1xf32>
    %27 = vector.broadcast %19 : vector<16x1xf32> to vector<16x32xf32>
    %28 = arith.subf %0, %27 : vector<16x32xf32>
    %cst_7 = arith.constant 9.99999974E-6 : f32
    %29 = vector.broadcast %cst_7 : f32 to vector<16x1xf32>
    %30 = arith.addf %26, %29 : vector<16x1xf32>
    %31 = math.rsqrt %30 : vector<16x1xf32>
    %32 = vector.broadcast %31 : vector<16x1xf32> to vector<16x32xf32>
    %33 = arith.mulf %28, %32 : vector<16x32xf32>
    %34 = vector.broadcast %9 : vector<1x32xf32> to vector<16x32xf32>
    %35 = arith.mulf %33, %34 : vector<16x32xf32>
    %36 = vector.broadcast %11 : vector<1x32xf32> to vector<16x32xf32>
    %37 = arith.addf %35, %36 : vector<16x32xf32>
    %c0_8 = arith.constant 0 : index
    %c0_9 = arith.constant 0 : index
    %c0_10 = arith.constant 0 : index
    %38 = vector.load %arg1[%c0_8, %c0_9, %c0_10] : memref<2x32x96xbf16, #tpu.memory_space<vmem>>, vector<1x32x96xbf16>
    %39 = vector.shape_cast %38 : vector<1x32x96xbf16> to vector<32x96xbf16>
    %40 = arith.truncf %37 : vector<16x32xf32> to vector<16x32xbf16>
    %cst_11 = arith.constant dense<0.000000e+00> : vector<16x96xf32>
    %41 = tpu.matmul %40, %39, %cst_11 {dimension_numbers = #tpu.dot_dimension_numbers<[1], [0], [0], [1], [0, 0, 1, 1], [], []>} : vector<16x32xbf16>, vector<32x96xbf16>, vector<16x96xf32> -> vector<16x96xf32>
    %42 = vector.broadcast %3 : vector<1x96xf32> to vector<16x96xf32>
    %43 = arith.addf %41, %42 : vector<16x96xf32>
    %44 = vector.extract_strided_slice %43 {offsets = [0, 0], sizes = [16, 8], strides = [1, 1]} : vector<16x96xf32> to vector<16x8xf32>
    %45 = vector.shape_cast %44 : vector<16x8xf32> to vector<2x8x8xf32>
    %46 = arith.truncf %45 : vector<2x8x8xf32> to vector<2x8x8xbf16>
    %47 = vector.extract_strided_slice %43 {offsets = [0, 32], sizes = [16, 8], strides = [1, 1]} : vector<16x96xf32> to vector<16x8xf32>
    %48 = vector.shape_cast %47 : vector<16x8xf32> to vector<2x8x8xf32>
    %49 = arith.truncf %48 : vector<2x8x8xf32> to vector<2x8x8xbf16>
    %50 = vector.extract_strided_slice %43 {offsets = [0, 64], sizes = [16, 8], strides = [1, 1]} : vector<16x96xf32> to vector<16x8xf32>
    %51 = vector.shape_cast %50 : vector<16x8xf32> to vector<2x8x8xf32>
    %52 = arith.truncf %51 : vector<2x8x8xf32> to vector<2x8x8xbf16>
    "tpu.trace_start"() <{level = 10 : i32, message = "bqd,bkd->bqk"}> : () -> ()
    %cst_12 = arith.constant dense<0.000000e+00> : vector<2x8x8xf32>
    %53 = tpu.matmul %46, %49, %cst_12 {dimension_numbers = #tpu.dot_dimension_numbers<[2], [2], [1], [1], [0, 0, 0, 1, 1, 1], [0], [0]>} : vector<2x8x8xbf16>, vector<2x8x8xbf16>, vector<2x8x8xf32> -> vector<2x8x8xf32>
    "tpu.trace_stop"() : () -> ()
    %cst_13 = arith.constant 0.353553385 : f32
    %54 = vector.broadcast %cst_13 : f32 to vector<2x8x8xf32>
    %55 = arith.mulf %53, %54 : vector<2x8x8xf32>
    %cst_14 = arith.constant dense<0xFF800000> : vector<2x8xf32>
    %56 = vector.multi_reduction <maximumf>, %55, %cst_14 [2] : vector<2x8x8xf32> to vector<2x8xf32>
    %57 = vector.shape_cast %56 : vector<2x8xf32> to vector<2x8x1xf32>
    %58 = vector.broadcast %57 : vector<2x8x1xf32> to vector<2x8x8xf32>
    %59 = arith.subf %55, %58 : vector<2x8x8xf32>
    %60 = math.exp %59 : vector<2x8x8xf32>
    %cst_15 = arith.constant dense<0.000000e+00> : vector<2x8xf32>
    %61 = vector.multi_reduction <add>, %60, %cst_15 [2] : vector<2x8x8xf32> to vector<2x8xf32>
    %62 = vector.shape_cast %61 : vector<2x8xf32> to vector<2x8x1xf32>
    %63 = tpu.reciprocal %62 {approx = true} : vector<2x8x1xf32> -> vector<2x8x1xf32>
    %64 = vector.broadcast %63 : vector<2x8x1xf32> to vector<2x8x8xf32>
    %65 = arith.mulf %60, %64 : vector<2x8x8xf32>
    %66 = arith.truncf %65 : vector<2x8x8xf32> to vector<2x8x8xbf16>
    "tpu.trace_start"() <{level = 10 : i32, message = "bqk,bkd->bqd"}> : () -> ()
    %cst_16 = arith.constant dense<0.000000e+00> : vector<2x8x8xf32>
    %67 = tpu.matmul %66, %52, %cst_16 {dimension_numbers = #tpu.dot_dimension_numbers<[2], [1], [1], [2], [0, 0, 0, 1, 1, 2], [0], [0]>} : vector<2x8x8xbf16>, vector<2x8x8xbf16>, vector<2x8x8xf32> -> vector<2x8x8xf32>
    "tpu.trace_stop"() : () -> ()
    %68 = vector.shape_cast %67 : vector<2x8x8xf32> to vector<16x8xf32>
    %c0_17 = arith.constant 0 : index
    %c0_18 = arith.constant 0 : index
    %69 = vector.load %arg9[%c0_17, %c0_18] : memref<16x32xf32, #tpu.memory_space<vmem>>, vector<16x8xf32>
    tpu.vector_store %arg9[%c0_17, %c0_18], %68 {strides = array<i32>} : memref<16x32xf32, #tpu.memory_space<vmem>>, vector<16x8xf32>,
    %70 = vector.extract_strided_slice %43 {offsets = [0, 8], sizes = [16, 8], strides = [1, 1]} : vector<16x96xf32> to vector<16x8xf32>
    %71 = vector.shape_cast %70 : vector<16x8xf32> to vector<2x8x8xf32>
    %72 = arith.truncf %71 : vector<2x8x8xf32> to vector<2x8x8xbf16>
    %73 = vector.extract_strided_slice %43 {offsets = [0, 40], sizes = [16, 8], strides = [1, 1]} : vector<16x96xf32> to vector<16x8xf32>
    %74 = vector.shape_cast %73 : vector<16x8xf32> to vector<2x8x8xf32>
    %75 = arith.truncf %74 : vector<2x8x8xf32> to vector<2x8x8xbf16>
    %76 = vector.extract_strided_slice %43 {offsets = [0, 72], sizes = [16, 8], strides = [1, 1]} : vector<16x96xf32> to vector<16x8xf32>
    %77 = vector.shape_cast %76 : vector<16x8xf32> to vector<2x8x8xf32>
    %78 = arith.truncf %77 : vector<2x8x8xf32> to vector<2x8x8xbf16>
    "tpu.trace_start"() <{level = 10 : i32, message = "bqd,bkd->bqk"}> : () -> ()
    %cst_19 = arith.constant dense<0.000000e+00> : vector<2x8x8xf32>
    %79 = tpu.matmul %72, %75, %cst_19 {dimension_numbers = #tpu.dot_dimension_numbers<[2], [2], [1], [1], [0, 0, 0, 1, 1, 1], [0], [0]>} : vector<2x8x8xbf16>, vector<2x8x8xbf16>, vector<2x8x8xf32> -> vector<2x8x8xf32>
    "tpu.trace_stop"() : () -> ()
    %cst_20 = arith.constant 0.353553385 : f32
    %80 = vector.broadcast %cst_20 : f32 to vector<2x8x8xf32>
    %81 = arith.mulf %79, %80 : vector<2x8x8xf32>
    %cst_21 = arith.constant dense<0xFF800000> : vector<2x8xf32>
    %82 = vector.multi_reduction <maximumf>, %81, %cst_21 [2] : vector<2x8x8xf32> to vector<2x8xf32>
    %83 = vector.shape_cast %82 : vector<2x8xf32> to vector<2x8x1xf32>
    %84 = vector.broadcast %83 : vector<2x8x1xf32> to vector<2x8x8xf32>
    %85 = arith.subf %81, %84 : vector<2x8x8xf32>
    %86 = math.exp %85 : vector<2x8x8xf32>
    %cst_22 = arith.constant dense<0.000000e+00> : vector<2x8xf32>
    %87 = vector.multi_reduction <add>, %86, %cst_22 [2] : vector<2x8x8xf32> to vector<2x8xf32>
    %88 = vector.shape_cast %87 : vector<2x8xf32> to vector<2x8x1xf32>
    %89 = tpu.reciprocal %88 {approx = true} : vector<2x8x1xf32> -> vector<2x8x1xf32>
    %90 = vector.broadcast %89 : vector<2x8x1xf32> to vector<2x8x8xf32>
    %91 = arith.mulf %86, %90 : vector<2x8x8xf32>
    %92 = arith.truncf %91 : vector<2x8x8xf32> to vector<2x8x8xbf16>
    "tpu.trace_start"() <{level = 10 : i32, message = "bqk,bkd->bqd"}> : () -> ()
    %cst_23 = arith.constant dense<0.000000e+00> : vector<2x8x8xf32>
    %93 = tpu.matmul %92, %78, %cst_23 {dimension_numbers = #tpu.dot_dimension_numbers<[2], [1], [1], [2], [0, 0, 0, 1, 1, 2], [0], [0]>} : vector<2x8x8xbf16>, vector<2x8x8xbf16>, vector<2x8x8xf32> -> vector<2x8x8xf32>
    "tpu.trace_stop"() : () -> ()
    %94 = vector.shape_cast %93 : vector<2x8x8xf32> to vector<16x8xf32>
    %c0_24 = arith.constant 0 : index
    %c8 = arith.constant 8 : index
    %95 = vector.load %arg9[%c0_24, %c8] : memref<16x32xf32, #tpu.memory_space<vmem>>, vector<16x8xf32>
    tpu.vector_store %arg9[%c0_24, %c8], %94 {strides = array<i32>} : memref<16x32xf32, #tpu.memory_space<vmem>>, vector<16x8xf32>,
    %96 = vector.extract_strided_slice %43 {offsets = [0, 16], sizes = [16, 8], strides = [1, 1]} : vector<16x96xf32> to vector<16x8xf32>
    %97 = vector.shape_cast %96 : vector<16x8xf32> to vector<2x8x8xf32>
    %98 = arith.truncf %97 : vector<2x8x8xf32> to vector<2x8x8xbf16>
    %99 = vector.extract_strided_slice %43 {offsets = [0, 48], sizes = [16, 8], strides = [1, 1]} : vector<16x96xf32> to vector<16x8xf32>
    %100 = vector.shape_cast %99 : vector<16x8xf32> to vector<2x8x8xf32>
    %101 = arith.truncf %100 : vector<2x8x8xf32> to vector<2x8x8xbf16>
    %102 = vector.extract_strided_slice %43 {offsets = [0, 80], sizes = [16, 8], strides = [1, 1]} : vector<16x96xf32> to vector<16x8xf32>
    %103 = vector.shape_cast %102 : vector<16x8xf32> to vector<2x8x8xf32>
    %104 = arith.truncf %103 : vector<2x8x8xf32> to vector<2x8x8xbf16>
    "tpu.trace_start"() <{level = 10 : i32, message = "bqd,bkd->bqk"}> : () -> ()
    %cst_25 = arith.constant dense<0.000000e+00> : vector<2x8x8xf32>
    %105 = tpu.matmul %98, %101, %cst_25 {dimension_numbers = #tpu.dot_dimension_numbers<[2], [2], [1], [1], [0, 0, 0, 1, 1, 1], [0], [0]>} : vector<2x8x8xbf16>, vector<2x8x8xbf16>, vector<2x8x8xf32> -> vector<2x8x8xf32>
    "tpu.trace_stop"() : () -> ()
    %cst_26 = arith.constant 0.353553385 : f32
    %106 = vector.broadcast %cst_26 : f32 to vector<2x8x8xf32>
    %107 = arith.mulf %105, %106 : vector<2x8x8xf32>
    %cst_27 = arith.constant dense<0xFF800000> : vector<2x8xf32>
    %108 = vector.multi_reduction <maximumf>, %107, %cst_27 [2] : vector<2x8x8xf32> to vector<2x8xf32>
    %109 = vector.shape_cast %108 : vector<2x8xf32> to vector<2x8x1xf32>
    %110 = vector.broadcast %109 : vector<2x8x1xf32> to vector<2x8x8xf32>
    %111 = arith.subf %107, %110 : vector<2x8x8xf32>
    %112 = math.exp %111 : vector<2x8x8xf32>
    %cst_28 = arith.constant dense<0.000000e+00> : vector<2x8xf32>
    %113 = vector.multi_reduction <add>, %112, %cst_28 [2] : vector<2x8x8xf32> to vector<2x8xf32>
    %114 = vector.shape_cast %113 : vector<2x8xf32> to vector<2x8x1xf32>
    %115 = tpu.reciprocal %114 {approx = true} : vector<2x8x1xf32> -> vector<2x8x1xf32>
    %116 = vector.broadcast %115 : vector<2x8x1xf32> to vector<2x8x8xf32>
    %117 = arith.mulf %112, %116 : vector<2x8x8xf32>
    %118 = arith.truncf %117 : vector<2x8x8xf32> to vector<2x8x8xbf16>
    "tpu.trace_start"() <{level = 10 : i32, message = "bqk,bkd->bqd"}> : () -> ()
    %cst_29 = arith.constant dense<0.000000e+00> : vector<2x8x8xf32>
    %119 = tpu.matmul %118, %104, %cst_29 {dimension_numbers = #tpu.dot_dimension_numbers<[2], [1], [1], [2], [0, 0, 0, 1, 1, 2], [0], [0]>} : vector<2x8x8xbf16>, vector<2x8x8xbf16>, vector<2x8x8xf32> -> vector<2x8x8xf32>
    "tpu.trace_stop"() : () -> ()
    %120 = vector.shape_cast %119 : vector<2x8x8xf32> to vector<16x8xf32>
    %c0_30 = arith.constant 0 : index
    %c16 = arith.constant 16 : index
    %121 = vector.load %arg9[%c0_30, %c16] : memref<16x32xf32, #tpu.memory_space<vmem>>, vector<16x8xf32>
    tpu.vector_store %arg9[%c0_30, %c16], %120 {strides = array<i32>} : memref<16x32xf32, #tpu.memory_space<vmem>>, vector<16x8xf32>,
    %122 = vector.extract_strided_slice %43 {offsets = [0, 24], sizes = [16, 8], strides = [1, 1]} : vector<16x96xf32> to vector<16x8xf32>
    %123 = vector.shape_cast %122 : vector<16x8xf32> to vector<2x8x8xf32>
    %124 = arith.truncf %123 : vector<2x8x8xf32> to vector<2x8x8xbf16>
    %125 = vector.extract_strided_slice %43 {offsets = [0, 56], sizes = [16, 8], strides = [1, 1]} : vector<16x96xf32> to vector<16x8xf32>
    %126 = vector.shape_cast %125 : vector<16x8xf32> to vector<2x8x8xf32>
    %127 = arith.truncf %126 : vector<2x8x8xf32> to vector<2x8x8xbf16>
    %128 = vector.extract_strided_slice %43 {offsets = [0, 88], sizes = [16, 8], strides = [1, 1]} : vector<16x96xf32> to vector<16x8xf32>
    %129 = vector.shape_cast %128 : vector<16x8xf32> to vector<2x8x8xf32>
    %130 = arith.truncf %129 : vector<2x8x8xf32> to vector<2x8x8xbf16>
    "tpu.trace_start"() <{level = 10 : i32, message = "bqd,bkd->bqk"}> : () -> ()
    %cst_31 = arith.constant dense<0.000000e+00> : vector<2x8x8xf32>
    %131 = tpu.matmul %124, %127, %cst_31 {dimension_numbers = #tpu.dot_dimension_numbers<[2], [2], [1], [1], [0, 0, 0, 1, 1, 1], [0], [0]>} : vector<2x8x8xbf16>, vector<2x8x8xbf16>, vector<2x8x8xf32> -> vector<2x8x8xf32>
    "tpu.trace_stop"() : () -> ()
    %cst_32 = arith.constant 0.353553385 : f32
    %132 = vector.broadcast %cst_32 : f32 to vector<2x8x8xf32>
    %133 = arith.mulf %131, %132 : vector<2x8x8xf32>
    %cst_33 = arith.constant dense<0xFF800000> : vector<2x8xf32>
    %134 = vector.multi_reduction <maximumf>, %133, %cst_33 [2] : vector<2x8x8xf32> to vector<2x8xf32>
    %135 = vector.shape_cast %134 : vector<2x8xf32> to vector<2x8x1xf32>
    %136 = vector.broadcast %135 : vector<2x8x1xf32> to vector<2x8x8xf32>
    %137 = arith.subf %133, %136 : vector<2x8x8xf32>
    %138 = math.exp %137 : vector<2x8x8xf32>
    %cst_34 = arith.constant dense<0.000000e+00> : vector<2x8xf32>
    %139 = vector.multi_reduction <add>, %138, %cst_34 [2] : vector<2x8x8xf32> to vector<2x8xf32>
    %140 = vector.shape_cast %139 : vector<2x8xf32> to vector<2x8x1xf32>
    %141 = tpu.reciprocal %140 {approx = true} : vector<2x8x1xf32> -> vector<2x8x1xf32>
    %142 = vector.broadcast %141 : vector<2x8x1xf32> to vector<2x8x8xf32>
    %143 = arith.mulf %138, %142 : vector<2x8x8xf32>
    %144 = arith.truncf %143 : vector<2x8x8xf32> to vector<2x8x8xbf16>
    "tpu.trace_start"() <{level = 10 : i32, message = "bqk,bkd->bqd"}> : () -> ()
    %cst_35 = arith.constant dense<0.000000e+00> : vector<2x8x8xf32>
    %145 = tpu.matmul %144, %130, %cst_35 {dimension_numbers = #tpu.dot_dimension_numbers<[2], [1], [1], [2], [0, 0, 0, 1, 1, 2], [0], [0]>} : vector<2x8x8xbf16>, vector<2x8x8xbf16>, vector<2x8x8xf32> -> vector<2x8x8xf32>
    "tpu.trace_stop"() : () -> ()
    %146 = vector.shape_cast %145 : vector<2x8x8xf32> to vector<16x8xf32>
    %c0_36 = arith.constant 0 : index
    %c24 = arith.constant 24 : index
    %147 = vector.load %arg9[%c0_36, %c24] : memref<16x32xf32, #tpu.memory_space<vmem>>, vector<16x8xf32>
    tpu.vector_store %arg9[%c0_36, %c24], %146 {strides = array<i32>} : memref<16x32xf32, #tpu.memory_space<vmem>>, vector<16x8xf32>,
    %c0_37 = arith.constant 0 : index
    %c0_38 = arith.constant 0 : index
    %148 = vector.load %arg9[%c0_37, %c0_38] : memref<16x32xf32, #tpu.memory_space<vmem>>, vector<16x32xf32>
    %149 = arith.addf %0, %148 : vector<16x32xf32>
    %cst_39 = arith.constant dense<0.000000e+00> : vector<16xf32>
    %150 = vector.multi_reduction <add>, %149, %cst_39 [1] : vector<16x32xf32> to vector<16xf32>
    %151 = vector.shape_cast %150 : vector<16xf32> to vector<16x1xf32>
    %cst_40 = arith.constant 3.200000e+01 : f32
    %152 = vector.broadcast %cst_40 : f32 to vector<16x1xf32>
    %153 = arith.divf %151, %152 : vector<16x1xf32>
    %154 = vector.broadcast %153 : vector<16x1xf32> to vector<16x32xf32>
    %155 = arith.subf %149, %154 : vector<16x32xf32>
    %156 = arith.mulf %155, %155 : vector<16x32xf32>
    %cst_41 = arith.constant dense<0.000000e+00> : vector<16xf32>
    %157 = vector.multi_reduction <add>, %156, %cst_41 [1] : vector<16x32xf32> to vector<16xf32>
    %158 = vector.shape_cast %157 : vector<16xf32> to vector<16x1xf32>
    %cst_42 = arith.constant 3.200000e+01 : f32
    %159 = vector.broadcast %cst_42 : f32 to vector<16x1xf32>
    %160 = arith.divf %158, %159 : vector<16x1xf32>
    %161 = vector.broadcast %153 : vector<16x1xf32> to vector<16x32xf32>
    %162 = arith.subf %149, %161 : vector<16x32xf32>
    %cst_43 = arith.constant 9.99999974E-6 : f32
    %163 = vector.broadcast %cst_43 : f32 to vector<16x1xf32>
    %164 = arith.addf %160, %163 : vector<16x1xf32>
    %165 = math.rsqrt %164 : vector<16x1xf32>
    %166 = vector.broadcast %165 : vector<16x1xf32> to vector<16x32xf32>
    %167 = arith.mulf %162, %166 : vector<16x32xf32>
    %168 = vector.broadcast %13 : vector<1x32xf32> to vector<16x32xf32>
    %169 = arith.mulf %167, %168 : vector<16x32xf32>
    %170 = vector.broadcast %15 : vector<1x32xf32> to vector<16x32xf32>
    %171 = arith.addf %169, %170 : vector<16x32xf32>
    %c0_44 = arith.constant 0 : index
    %c0_45 = arith.constant 0 : index
    %c0_46 = arith.constant 0 : index
    %172 = vector.load %arg2[%c0_44, %c0_45, %c0_46] : memref<2x32x64xbf16, #tpu.memory_space<vmem>>, vector<1x32x64xbf16>
    %173 = vector.shape_cast %172 : vector<1x32x64xbf16> to vector<32x64xbf16>
    %174 = arith.truncf %171 : vector<16x32xf32> to vector<16x32xbf16>
    %cst_47 = arith.constant dense<0.000000e+00> : vector<16x64xf32>
    %175 = tpu.matmul %174, %173, %cst_47 {dimension_numbers = #tpu.dot_dimension_numbers<[1], [0], [0], [1], [0, 0, 1, 1], [], []>} : vector<16x32xbf16>, vector<32x64xbf16>, vector<16x64xf32> -> vector<16x64xf32>
    %176 = vector.broadcast %5 : vector<1x64xf32> to vector<16x64xf32>
    %177 = arith.addf %175, %176 : vector<16x64xf32>
    %cst_48 = arith.constant 0.000000e+00 : f32
    %178 = vector.broadcast %cst_48 : f32 to vector<16x64xf32>
    %179 = arith.maximumf %177, %178 : vector<16x64xf32>
    %c0_49 = arith.constant 0 : index
    %c0_50 = arith.constant 0 : index
    %c0_51 = arith.constant 0 : index
    %180 = vector.load %arg3[%c0_49, %c0_50, %c0_51] : memref<2x64x32xbf16, #tpu.memory_space<vmem>>, vector<1x64x32xbf16>
    %181 = vector.shape_cast %180 : vector<1x64x32xbf16> to vector<64x32xbf16>
    %182 = arith.truncf %179 : vector<16x64xf32> to vector<16x64xbf16>
    %cst_52 = arith.constant dense<0.000000e+00> : vector<16x32xf32>
    %183 = tpu.matmul %182, %181, %cst_52 {dimension_numbers = #tpu.dot_dimension_numbers<[1], [0], [0], [1], [0, 0, 1, 1], [], []>} : vector<16x64xbf16>, vector<64x32xbf16>, vector<16x32xf32> -> vector<16x32xf32>
    %184 = arith.addf %149, %183 : vector<16x32xf32>
    %185 = vector.broadcast %7 : vector<1x32xf32> to vector<16x32xf32>
    %186 = arith.addf %184, %185 : vector<16x32xf32>
    %187 = vector.extract_strided_slice %1 {offsets = [1, 0, 0], sizes = [1, 1, 96], strides = [1, 1, 1]} : vector<2x7x96xf32> to vector<1x1x96xf32>
    %188 = vector.shape_cast %187 : vector<1x1x96xf32> to vector<1x96xf32>
    %189 = vector.extract_strided_slice %1 {offsets = [1, 1, 0], sizes = [1, 1, 64], strides = [1, 1, 1]} : vector<2x7x96xf32> to vector<1x1x64xf32>
    %190 = vector.shape_cast %189 : vector<1x1x64xf32> to vector<1x64xf32>
    %191 = vector.extract_strided_slice %1 {offsets = [1, 2, 0], sizes = [1, 1, 32], strides = [1, 1, 1]} : vector<2x7x96xf32> to vector<1x1x32xf32>
    %192 = vector.shape_cast %191 : vector<1x1x32xf32> to vector<1x32xf32>
    %193 = vector.extract_strided_slice %1 {offsets = [1, 3, 0], sizes = [1, 1, 32], strides = [1, 1, 1]} : vector<2x7x96xf32> to vector<1x1x32xf32>
    %194 = vector.shape_cast %193 : vector<1x1x32xf32> to vector<1x32xf32>
    %195 = vector.extract_strided_slice %1 {offsets = [1, 4, 0], sizes = [1, 1, 32], strides = [1, 1, 1]} : vector<2x7x96xf32> to vector<1x1x32xf32>
    %196 = vector.shape_cast %195 : vector<1x1x32xf32> to vector<1x32xf32>
    %197 = vector.extract_strided_slice %1 {offsets = [1, 5, 0], sizes = [1, 1, 32], strides = [1, 1, 1]} : vector<2x7x96xf32> to vector<1x1x32xf32>
    %198 = vector.shape_cast %197 : vector<1x1x32xf32> to vector<1x32xf32>
    %199 = vector.extract_strided_slice %1 {offsets = [1, 6, 0], sizes = [1, 1, 32], strides = [1, 1, 1]} : vector<2x7x96xf32> to vector<1x1x32xf32>
    %200 = vector.shape_cast %199 : vector<1x1x32xf32> to vector<1x32xf32>
    %cst_53 = arith.constant dense<0.000000e+00> : vector<16xf32>
    %201 = vector.multi_reduction <add>, %186, %cst_53 [1] : vector<16x32xf32> to vector<16xf32>
    %202 = vector.shape_cast %201 : vector<16xf32> to vector<16x1xf32>
    %cst_54 = arith.constant 3.200000e+01 : f32
    %203 = vector.broadcast %cst_54 : f32 to vector<16x1xf32>
    %204 = arith.divf %202, %203 : vector<16x1xf32>
    %205 = vector.broadcast %204 : vector<16x1xf32> to vector<16x32xf32>
    %206 = arith.subf %186, %205 : vector<16x32xf32>
    %207 = arith.mulf %206, %206 : vector<16x32xf32>
    %cst_55 = arith.constant dense<0.000000e+00> : vector<16xf32>
    %208 = vector.multi_reduction <add>, %207, %cst_55 [1] : vector<16x32xf32> to vector<16xf32>
    %209 = vector.shape_cast %208 : vector<16xf32> to vector<16x1xf32>
    %cst_56 = arith.constant 3.200000e+01 : f32
    %210 = vector.broadcast %cst_56 : f32 to vector<16x1xf32>
    %211 = arith.divf %209, %210 : vector<16x1xf32>
    %212 = vector.broadcast %204 : vector<16x1xf32> to vector<16x32xf32>
    %213 = arith.subf %186, %212 : vector<16x32xf32>
    %cst_57 = arith.constant 9.99999974E-6 : f32
    %214 = vector.broadcast %cst_57 : f32 to vector<16x1xf32>
    %215 = arith.addf %211, %214 : vector<16x1xf32>
    %216 = math.rsqrt %215 : vector<16x1xf32>
    %217 = vector.broadcast %216 : vector<16x1xf32> to vector<16x32xf32>
    %218 = arith.mulf %213, %217 : vector<16x32xf32>
    %219 = vector.broadcast %194 : vector<1x32xf32> to vector<16x32xf32>
    %220 = arith.mulf %218, %219 : vector<16x32xf32>
    %221 = vector.broadcast %196 : vector<1x32xf32> to vector<16x32xf32>
    %222 = arith.addf %220, %221 : vector<16x32xf32>
    %c1 = arith.constant 1 : index
    %c0_58 = arith.constant 0 : index
    %c0_59 = arith.constant 0 : index
    %223 = vector.load %arg1[%c1, %c0_58, %c0_59] : memref<2x32x96xbf16, #tpu.memory_space<vmem>>, vector<1x32x96xbf16>
    %224 = vector.shape_cast %223 : vector<1x32x96xbf16> to vector<32x96xbf16>
    %225 = arith.truncf %222 : vector<16x32xf32> to vector<16x32xbf16>
    %cst_60 = arith.constant dense<0.000000e+00> : vector<16x96xf32>
    %226 = tpu.matmul %225, %224, %cst_60 {dimension_numbers = #tpu.dot_dimension_numbers<[1], [0], [0], [1], [0, 0, 1, 1], [], []>} : vector<16x32xbf16>, vector<32x96xbf16>, vector<16x96xf32> -> vector<16x96xf32>
    %227 = vector.broadcast %188 : vector<1x96xf32> to vector<16x96xf32>
    %228 = arith.addf %226, %227 : vector<16x96xf32>
    %229 = vector.extract_strided_slice %228 {offsets = [0, 0], sizes = [16, 8], strides = [1, 1]} : vector<16x96xf32> to vector<16x8xf32>
    %230 = vector.shape_cast %229 : vector<16x8xf32> to vector<2x8x8xf32>
    %231 = arith.truncf %230 : vector<2x8x8xf32> to vector<2x8x8xbf16>
    %232 = vector.extract_strided_slice %228 {offsets = [0, 32], sizes = [16, 8], strides = [1, 1]} : vector<16x96xf32> to vector<16x8xf32>
    %233 = vector.shape_cast %232 : vector<16x8xf32> to vector<2x8x8xf32>
    %234 = arith.truncf %233 : vector<2x8x8xf32> to vector<2x8x8xbf16>
    %235 = vector.extract_strided_slice %228 {offsets = [0, 64], sizes = [16, 8], strides = [1, 1]} : vector<16x96xf32> to vector<16x8xf32>
    %236 = vector.shape_cast %235 : vector<16x8xf32> to vector<2x8x8xf32>
    %237 = arith.truncf %236 : vector<2x8x8xf32> to vector<2x8x8xbf16>
    "tpu.trace_start"() <{level = 10 : i32, message = "bqd,bkd->bqk"}> : () -> ()
    %cst_61 = arith.constant dense<0.000000e+00> : vector<2x8x8xf32>
    %238 = tpu.matmul %231, %234, %cst_61 {dimension_numbers = #tpu.dot_dimension_numbers<[2], [2], [1], [1], [0, 0, 0, 1, 1, 1], [0], [0]>} : vector<2x8x8xbf16>, vector<2x8x8xbf16>, vector<2x8x8xf32> -> vector<2x8x8xf32>
    "tpu.trace_stop"() : () -> ()
    %cst_62 = arith.constant 0.353553385 : f32
    %239 = vector.broadcast %cst_62 : f32 to vector<2x8x8xf32>
    %240 = arith.mulf %238, %239 : vector<2x8x8xf32>
    %cst_63 = arith.constant dense<0xFF800000> : vector<2x8xf32>
    %241 = vector.multi_reduction <maximumf>, %240, %cst_63 [2] : vector<2x8x8xf32> to vector<2x8xf32>
    %242 = vector.shape_cast %241 : vector<2x8xf32> to vector<2x8x1xf32>
    %243 = vector.broadcast %242 : vector<2x8x1xf32> to vector<2x8x8xf32>
    %244 = arith.subf %240, %243 : vector<2x8x8xf32>
    %245 = math.exp %244 : vector<2x8x8xf32>
    %cst_64 = arith.constant dense<0.000000e+00> : vector<2x8xf32>
    %246 = vector.multi_reduction <add>, %245, %cst_64 [2] : vector<2x8x8xf32> to vector<2x8xf32>
    %247 = vector.shape_cast %246 : vector<2x8xf32> to vector<2x8x1xf32>
    %248 = tpu.reciprocal %247 {approx = true} : vector<2x8x1xf32> -> vector<2x8x1xf32>
    %249 = vector.broadcast %248 : vector<2x8x1xf32> to vector<2x8x8xf32>
    %250 = arith.mulf %245, %249 : vector<2x8x8xf32>
    %251 = arith.truncf %250 : vector<2x8x8xf32> to vector<2x8x8xbf16>
    "tpu.trace_start"() <{level = 10 : i32, message = "bqk,bkd->bqd"}> : () -> ()
    %cst_65 = arith.constant dense<0.000000e+00> : vector<2x8x8xf32>
    %252 = tpu.matmul %251, %237, %cst_65 {dimension_numbers = #tpu.dot_dimension_numbers<[2], [1], [1], [2], [0, 0, 0, 1, 1, 2], [0], [0]>} : vector<2x8x8xbf16>, vector<2x8x8xbf16>, vector<2x8x8xf32> -> vector<2x8x8xf32>
    "tpu.trace_stop"() : () -> ()
    %253 = vector.shape_cast %252 : vector<2x8x8xf32> to vector<16x8xf32>
    %c0_66 = arith.constant 0 : index
    %c0_67 = arith.constant 0 : index
    %254 = vector.load %arg9[%c0_66, %c0_67] : memref<16x32xf32, #tpu.memory_space<vmem>>, vector<16x8xf32>
    tpu.vector_store %arg9[%c0_66, %c0_67], %253 {strides = array<i32>} : memref<16x32xf32, #tpu.memory_space<vmem>>, vector<16x8xf32>,
    %255 = vector.extract_strided_slice %228 {offsets = [0, 8], sizes = [16, 8], strides = [1, 1]} : vector<16x96xf32> to vector<16x8xf32>
    %256 = vector.shape_cast %255 : vector<16x8xf32> to vector<2x8x8xf32>
    %257 = arith.truncf %256 : vector<2x8x8xf32> to vector<2x8x8xbf16>
    %258 = vector.extract_strided_slice %228 {offsets = [0, 40], sizes = [16, 8], strides = [1, 1]} : vector<16x96xf32> to vector<16x8xf32>
    %259 = vector.shape_cast %258 : vector<16x8xf32> to vector<2x8x8xf32>
    %260 = arith.truncf %259 : vector<2x8x8xf32> to vector<2x8x8xbf16>
    %261 = vector.extract_strided_slice %228 {offsets = [0, 72], sizes = [16, 8], strides = [1, 1]} : vector<16x96xf32> to vector<16x8xf32>
    %262 = vector.shape_cast %261 : vector<16x8xf32> to vector<2x8x8xf32>
    %263 = arith.truncf %262 : vector<2x8x8xf32> to vector<2x8x8xbf16>
    "tpu.trace_start"() <{level = 10 : i32, message = "bqd,bkd->bqk"}> : () -> ()
    %cst_68 = arith.constant dense<0.000000e+00> : vector<2x8x8xf32>
    %264 = tpu.matmul %257, %260, %cst_68 {dimension_numbers = #tpu.dot_dimension_numbers<[2], [2], [1], [1], [0, 0, 0, 1, 1, 1], [0], [0]>} : vector<2x8x8xbf16>, vector<2x8x8xbf16>, vector<2x8x8xf32> -> vector<2x8x8xf32>
    "tpu.trace_stop"() : () -> ()
    %cst_69 = arith.constant 0.353553385 : f32
    %265 = vector.broadcast %cst_69 : f32 to vector<2x8x8xf32>
    %266 = arith.mulf %264, %265 : vector<2x8x8xf32>
    %cst_70 = arith.constant dense<0xFF800000> : vector<2x8xf32>
    %267 = vector.multi_reduction <maximumf>, %266, %cst_70 [2] : vector<2x8x8xf32> to vector<2x8xf32>
    %268 = vector.shape_cast %267 : vector<2x8xf32> to vector<2x8x1xf32>
    %269 = vector.broadcast %268 : vector<2x8x1xf32> to vector<2x8x8xf32>
    %270 = arith.subf %266, %269 : vector<2x8x8xf32>
    %271 = math.exp %270 : vector<2x8x8xf32>
    %cst_71 = arith.constant dense<0.000000e+00> : vector<2x8xf32>
    %272 = vector.multi_reduction <add>, %271, %cst_71 [2] : vector<2x8x8xf32> to vector<2x8xf32>
    %273 = vector.shape_cast %272 : vector<2x8xf32> to vector<2x8x1xf32>
    %274 = tpu.reciprocal %273 {approx = true} : vector<2x8x1xf32> -> vector<2x8x1xf32>
    %275 = vector.broadcast %274 : vector<2x8x1xf32> to vector<2x8x8xf32>
    %276 = arith.mulf %271, %275 : vector<2x8x8xf32>
    %277 = arith.truncf %276 : vector<2x8x8xf32> to vector<2x8x8xbf16>
    "tpu.trace_start"() <{level = 10 : i32, message = "bqk,bkd->bqd"}> : () -> ()
    %cst_72 = arith.constant dense<0.000000e+00> : vector<2x8x8xf32>
    %278 = tpu.matmul %277, %263, %cst_72 {dimension_numbers = #tpu.dot_dimension_numbers<[2], [1], [1], [2], [0, 0, 0, 1, 1, 2], [0], [0]>} : vector<2x8x8xbf16>, vector<2x8x8xbf16>, vector<2x8x8xf32> -> vector<2x8x8xf32>
    "tpu.trace_stop"() : () -> ()
    %279 = vector.shape_cast %278 : vector<2x8x8xf32> to vector<16x8xf32>
    %c0_73 = arith.constant 0 : index
    %c8_74 = arith.constant 8 : index
    %280 = vector.load %arg9[%c0_73, %c8_74] : memref<16x32xf32, #tpu.memory_space<vmem>>, vector<16x8xf32>
    tpu.vector_store %arg9[%c0_73, %c8_74], %279 {strides = array<i32>} : memref<16x32xf32, #tpu.memory_space<vmem>>, vector<16x8xf32>,
    %281 = vector.extract_strided_slice %228 {offsets = [0, 16], sizes = [16, 8], strides = [1, 1]} : vector<16x96xf32> to vector<16x8xf32>
    %282 = vector.shape_cast %281 : vector<16x8xf32> to vector<2x8x8xf32>
    %283 = arith.truncf %282 : vector<2x8x8xf32> to vector<2x8x8xbf16>
    %284 = vector.extract_strided_slice %228 {offsets = [0, 48], sizes = [16, 8], strides = [1, 1]} : vector<16x96xf32> to vector<16x8xf32>
    %285 = vector.shape_cast %284 : vector<16x8xf32> to vector<2x8x8xf32>
    %286 = arith.truncf %285 : vector<2x8x8xf32> to vector<2x8x8xbf16>
    %287 = vector.extract_strided_slice %228 {offsets = [0, 80], sizes = [16, 8], strides = [1, 1]} : vector<16x96xf32> to vector<16x8xf32>
    %288 = vector.shape_cast %287 : vector<16x8xf32> to vector<2x8x8xf32>
    %289 = arith.truncf %288 : vector<2x8x8xf32> to vector<2x8x8xbf16>
    "tpu.trace_start"() <{level = 10 : i32, message = "bqd,bkd->bqk"}> : () -> ()
    %cst_75 = arith.constant dense<0.000000e+00> : vector<2x8x8xf32>
    %290 = tpu.matmul %283, %286, %cst_75 {dimension_numbers = #tpu.dot_dimension_numbers<[2], [2], [1], [1], [0, 0, 0, 1, 1, 1], [0], [0]>} : vector<2x8x8xbf16>, vector<2x8x8xbf16>, vector<2x8x8xf32> -> vector<2x8x8xf32>
    "tpu.trace_stop"() : () -> ()
    %cst_76 = arith.constant 0.353553385 : f32
    %291 = vector.broadcast %cst_76 : f32 to vector<2x8x8xf32>
    %292 = arith.mulf %290, %291 : vector<2x8x8xf32>
    %cst_77 = arith.constant dense<0xFF800000> : vector<2x8xf32>
    %293 = vector.multi_reduction <maximumf>, %292, %cst_77 [2] : vector<2x8x8xf32> to vector<2x8xf32>
    %294 = vector.shape_cast %293 : vector<2x8xf32> to vector<2x8x1xf32>
    %295 = vector.broadcast %294 : vector<2x8x1xf32> to vector<2x8x8xf32>
    %296 = arith.subf %292, %295 : vector<2x8x8xf32>
    %297 = math.exp %296 : vector<2x8x8xf32>
    %cst_78 = arith.constant dense<0.000000e+00> : vector<2x8xf32>
    %298 = vector.multi_reduction <add>, %297, %cst_78 [2] : vector<2x8x8xf32> to vector<2x8xf32>
    %299 = vector.shape_cast %298 : vector<2x8xf32> to vector<2x8x1xf32>
    %300 = tpu.reciprocal %299 {approx = true} : vector<2x8x1xf32> -> vector<2x8x1xf32>
    %301 = vector.broadcast %300 : vector<2x8x1xf32> to vector<2x8x8xf32>
    %302 = arith.mulf %297, %301 : vector<2x8x8xf32>
    %303 = arith.truncf %302 : vector<2x8x8xf32> to vector<2x8x8xbf16>
    "tpu.trace_start"() <{level = 10 : i32, message = "bqk,bkd->bqd"}> : () -> ()
    %cst_79 = arith.constant dense<0.000000e+00> : vector<2x8x8xf32>
    %304 = tpu.matmul %303, %289, %cst_79 {dimension_numbers = #tpu.dot_dimension_numbers<[2], [1], [1], [2], [0, 0, 0, 1, 1, 2], [0], [0]>} : vector<2x8x8xbf16>, vector<2x8x8xbf16>, vector<2x8x8xf32> -> vector<2x8x8xf32>
    "tpu.trace_stop"() : () -> ()
    %305 = vector.shape_cast %304 : vector<2x8x8xf32> to vector<16x8xf32>
    %c0_80 = arith.constant 0 : index
    %c16_81 = arith.constant 16 : index
    %306 = vector.load %arg9[%c0_80, %c16_81] : memref<16x32xf32, #tpu.memory_space<vmem>>, vector<16x8xf32>
    tpu.vector_store %arg9[%c0_80, %c16_81], %305 {strides = array<i32>} : memref<16x32xf32, #tpu.memory_space<vmem>>, vector<16x8xf32>,
    %307 = vector.extract_strided_slice %228 {offsets = [0, 24], sizes = [16, 8], strides = [1, 1]} : vector<16x96xf32> to vector<16x8xf32>
    %308 = vector.shape_cast %307 : vector<16x8xf32> to vector<2x8x8xf32>
    %309 = arith.truncf %308 : vector<2x8x8xf32> to vector<2x8x8xbf16>
    %310 = vector.extract_strided_slice %228 {offsets = [0, 56], sizes = [16, 8], strides = [1, 1]} : vector<16x96xf32> to vector<16x8xf32>
    %311 = vector.shape_cast %310 : vector<16x8xf32> to vector<2x8x8xf32>
    %312 = arith.truncf %311 : vector<2x8x8xf32> to vector<2x8x8xbf16>
    %313 = vector.extract_strided_slice %228 {offsets = [0, 88], sizes = [16, 8], strides = [1, 1]} : vector<16x96xf32> to vector<16x8xf32>
    %314 = vector.shape_cast %313 : vector<16x8xf32> to vector<2x8x8xf32>
    %315 = arith.truncf %314 : vector<2x8x8xf32> to vector<2x8x8xbf16>
    "tpu.trace_start"() <{level = 10 : i32, message = "bqd,bkd->bqk"}> : () -> ()
    %cst_82 = arith.constant dense<0.000000e+00> : vector<2x8x8xf32>
    %316 = tpu.matmul %309, %312, %cst_82 {dimension_numbers = #tpu.dot_dimension_numbers<[2], [2], [1], [1], [0, 0, 0, 1, 1, 1], [0], [0]>} : vector<2x8x8xbf16>, vector<2x8x8xbf16>, vector<2x8x8xf32> -> vector<2x8x8xf32>
    "tpu.trace_stop"() : () -> ()
    %cst_83 = arith.constant 0.353553385 : f32
    %317 = vector.broadcast %cst_83 : f32 to vector<2x8x8xf32>
    %318 = arith.mulf %316, %317 : vector<2x8x8xf32>
    %cst_84 = arith.constant dense<0xFF800000> : vector<2x8xf32>
    %319 = vector.multi_reduction <maximumf>, %318, %cst_84 [2] : vector<2x8x8xf32> to vector<2x8xf32>
    %320 = vector.shape_cast %319 : vector<2x8xf32> to vector<2x8x1xf32>
    %321 = vector.broadcast %320 : vector<2x8x1xf32> to vector<2x8x8xf32>
    %322 = arith.subf %318, %321 : vector<2x8x8xf32>
    %323 = math.exp %322 : vector<2x8x8xf32>
    %cst_85 = arith.constant dense<0.000000e+00> : vector<2x8xf32>
    %324 = vector.multi_reduction <add>, %323, %cst_85 [2] : vector<2x8x8xf32> to vector<2x8xf32>
    %325 = vector.shape_cast %324 : vector<2x8xf32> to vector<2x8x1xf32>
    %326 = tpu.reciprocal %325 {approx = true} : vector<2x8x1xf32> -> vector<2x8x1xf32>
    %327 = vector.broadcast %326 : vector<2x8x1xf32> to vector<2x8x8xf32>
    %328 = arith.mulf %323, %327 : vector<2x8x8xf32>
    %329 = arith.truncf %328 : vector<2x8x8xf32> to vector<2x8x8xbf16>
    "tpu.trace_start"() <{level = 10 : i32, message = "bqk,bkd->bqd"}> : () -> ()
    %cst_86 = arith.constant dense<0.000000e+00> : vector<2x8x8xf32>
    %330 = tpu.matmul %329, %315, %cst_86 {dimension_numbers = #tpu.dot_dimension_numbers<[2], [1], [1], [2], [0, 0, 0, 1, 1, 2], [0], [0]>} : vector<2x8x8xbf16>, vector<2x8x8xbf16>, vector<2x8x8xf32> -> vector<2x8x8xf32>
    "tpu.trace_stop"() : () -> ()
    %331 = vector.shape_cast %330 : vector<2x8x8xf32> to vector<16x8xf32>
    %c0_87 = arith.constant 0 : index
    %c24_88 = arith.constant 24 : index
    %332 = vector.load %arg9[%c0_87, %c24_88] : memref<16x32xf32, #tpu.memory_space<vmem>>, vector<16x8xf32>
    tpu.vector_store %arg9[%c0_87, %c24_88], %331 {strides = array<i32>} : memref<16x32xf32, #tpu.memory_space<vmem>>, vector<16x8xf32>,
    %c0_89 = arith.constant 0 : index
    %c0_90 = arith.constant 0 : index
    %333 = vector.load %arg9[%c0_89, %c0_90] : memref<16x32xf32, #tpu.memory_space<vmem>>, vector<16x32xf32>
    %334 = arith.addf %186, %333 : vector<16x32xf32>
    %cst_91 = arith.constant dense<0.000000e+00> : vector<16xf32>
    %335 = vector.multi_reduction <add>, %334, %cst_91 [1] : vector<16x32xf32> to vector<16xf32>
    %336 = vector.shape_cast %335 : vector<16xf32> to vector<16x1xf32>
    %cst_92 = arith.constant 3.200000e+01 : f32
    %337 = vector.broadcast %cst_92 : f32 to vector<16x1xf32>
    %338 = arith.divf %336, %337 : vector<16x1xf32>
    %339 = vector.broadcast %338 : vector<16x1xf32> to vector<16x32xf32>
    %340 = arith.subf %334, %339 : vector<16x32xf32>
    %341 = arith.mulf %340, %340 : vector<16x32xf32>
    %cst_93 = arith.constant dense<0.000000e+00> : vector<16xf32>
    %342 = vector.multi_reduction <add>, %341, %cst_93 [1] : vector<16x32xf32> to vector<16xf32>
    %343 = vector.shape_cast %342 : vector<16xf32> to vector<16x1xf32>
    %cst_94 = arith.constant 3.200000e+01 : f32
    %344 = vector.broadcast %cst_94 : f32 to vector<16x1xf32>
    %345 = arith.divf %343, %344 : vector<16x1xf32>
    %346 = vector.broadcast %338 : vector<16x1xf32> to vector<16x32xf32>
    %347 = arith.subf %334, %346 : vector<16x32xf32>
    %cst_95 = arith.constant 9.99999974E-6 : f32
    %348 = vector.broadcast %cst_95 : f32 to vector<16x1xf32>
    %349 = arith.addf %345, %348 : vector<16x1xf32>
    %350 = math.rsqrt %349 : vector<16x1xf32>
    %351 = vector.broadcast %350 : vector<16x1xf32> to vector<16x32xf32>
    %352 = arith.mulf %347, %351 : vector<16x32xf32>
    %353 = vector.broadcast %198 : vector<1x32xf32> to vector<16x32xf32>
    %354 = arith.mulf %352, %353 : vector<16x32xf32>
    %355 = vector.broadcast %200 : vector<1x32xf32> to vector<16x32xf32>
    %356 = arith.addf %354, %355 : vector<16x32xf32>
    %c1_96 = arith.constant 1 : index
    %c0_97 = arith.constant 0 : index
    %c0_98 = arith.constant 0 : index
    %357 = vector.load %arg2[%c1_96, %c0_97, %c0_98] : memref<2x32x64xbf16, #tpu.memory_space<vmem>>, vector<1x32x64xbf16>
    %358 = vector.shape_cast %357 : vector<1x32x64xbf16> to vector<32x64xbf16>
    %359 = arith.truncf %356 : vector<16x32xf32> to vector<16x32xbf16>
    %cst_99 = arith.constant dense<0.000000e+00> : vector<16x64xf32>
    %360 = tpu.matmul %359, %358, %cst_99 {dimension_numbers = #tpu.dot_dimension_numbers<[1], [0], [0], [1], [0, 0, 1, 1], [], []>} : vector<16x32xbf16>, vector<32x64xbf16>, vector<16x64xf32> -> vector<16x64xf32>
    %361 = vector.broadcast %190 : vector<1x64xf32> to vector<16x64xf32>
    %362 = arith.addf %360, %361 : vector<16x64xf32>
    %cst_100 = arith.constant 0.000000e+00 : f32
    %363 = vector.broadcast %cst_100 : f32 to vector<16x64xf32>
    %364 = arith.maximumf %362, %363 : vector<16x64xf32>
    %c1_101 = arith.constant 1 : index
    %c0_102 = arith.constant 0 : index
    %c0_103 = arith.constant 0 : index
    %365 = vector.load %arg3[%c1_101, %c0_102, %c0_103] : memref<2x64x32xbf16, #tpu.memory_space<vmem>>, vector<1x64x32xbf16>
    %366 = vector.shape_cast %365 : vector<1x64x32xbf16> to vector<64x32xbf16>
    %367 = arith.truncf %364 : vector<16x64xf32> to vector<16x64xbf16>
    %cst_104 = arith.constant dense<0.000000e+00> : vector<16x32xf32>
    %368 = tpu.matmul %367, %366, %cst_104 {dimension_numbers = #tpu.dot_dimension_numbers<[1], [0], [0], [1], [0, 0, 1, 1], [], []>} : vector<16x64xbf16>, vector<64x32xbf16>, vector<16x32xf32> -> vector<16x32xf32>
    %369 = arith.addf %334, %368 : vector<16x32xf32>
    %370 = vector.broadcast %192 : vector<1x32xf32> to vector<16x32xf32>
    %371 = arith.addf %369, %370 : vector<16x32xf32>
    %372 = vector.shape_cast %371 : vector<16x32xf32> to vector<2x8x32xf32>
    %cst_105 = arith.constant dense<0.000000e+00> : vector<2x32xf32>
    %373 = vector.multi_reduction <add>, %372, %cst_105 [1] : vector<2x8x32xf32> to vector<2x32xf32>
    %cst_106 = arith.constant 8.000000e+00 : f32
    %374 = vector.broadcast %cst_106 : f32 to vector<2x32xf32>
    %375 = arith.divf %373, %374 : vector<2x32xf32>
    %c0_107 = arith.constant 0 : index
    %c0_108 = arith.constant 0 : index
    %376 = vector.load %arg7[%c0_107, %c0_108] : memref<2x32xf32, #tpu.memory_space<vmem>>, vector<2x32xf32>
    %c0_109 = arith.constant 0 : index
    %c0_110 = arith.constant 0 : index
    %377 = vector.load %arg5[%c0_109, %c0_110] : memref<32x32xbf16, #tpu.memory_space<vmem>>, vector<32x32xbf16>
    %378 = arith.truncf %375 : vector<2x32xf32> to vector<2x32xbf16>
    %cst_111 = arith.constant dense<0.000000e+00> : vector<2x32xf32>
    %379 = tpu.matmul %378, %377, %cst_111 {dimension_numbers = #tpu.dot_dimension_numbers<[1], [0], [0], [1], [0, 0, 1, 1], [], []>} : vector<2x32xbf16>, vector<32x32xbf16>, vector<2x32xf32> -> vector<2x32xf32>
    %380 = vector.extract_strided_slice %376 {offsets = [0, 0], sizes = [1, 32], strides = [1, 1]} : vector<2x32xf32> to vector<1x32xf32>
    %381 = vector.broadcast %380 : vector<1x32xf32> to vector<2x32xf32>
    %382 = arith.addf %379, %381 : vector<2x32xf32>
    %cst_112 = arith.constant 0.000000e+00 : f32
    %383 = vector.broadcast %cst_112 : f32 to vector<2x32xf32>
    %384 = arith.maximumf %382, %383 : vector<2x32xf32>
    %c0_113 = arith.constant 0 : index
    %c0_114 = arith.constant 0 : index
    %385 = vector.load %arg6[%c0_113, %c0_114] : memref<32x3xbf16, #tpu.memory_space<vmem>>, vector<32x3xbf16>
    %386 = arith.truncf %384 : vector<2x32xf32> to vector<2x32xbf16>
    %cst_115 = arith.constant dense<0.000000e+00> : vector<2x3xf32>
    %387 = tpu.matmul %386, %385, %cst_115 {dimension_numbers = #tpu.dot_dimension_numbers<[1], [0], [0], [1], [0, 0, 1, 1], [], []>} : vector<2x32xbf16>, vector<32x3xbf16>, vector<2x3xf32> -> vector<2x3xf32>
    %388 = vector.extract_strided_slice %376 {offsets = [1, 0], sizes = [1, 3], strides = [1, 1]} : vector<2x32xf32> to vector<1x3xf32>
    %389 = vector.broadcast %388 : vector<1x3xf32> to vector<2x3xf32>
    %390 = arith.addf %387, %389 : vector<2x3xf32>
    %c0_116 = arith.constant 0 : index
    %c0_117 = arith.constant 0 : index
    %391 = vector.load %arg8[%c0_116, %c0_117] : memref<2x3xf32, #tpu.memory_space<vmem>>, vector<2x3xf32>
    tpu.vector_store %arg8[%c0_116, %c0_117], %390 {strides = array<i32>} : memref<2x3xf32, #tpu.memory_space<vmem>>, vector<2x3xf32>,
    return
  }
}

</mosaic_0001>

<bundles_post_ra>
// kernel: transformer_forward.1
= control target key start
LH: loop header
LB: loop body
LE: loop exit
PB: predicated region body
PF: predicated region fallthrough
CT: control target
= control target key end

     0   :  { %vm35_vm0 = vcmask 261120   ;;  %s3864_s0 = inlined_call_operand.vmem [shape: f32[16,32], index: 0, kind: input, shape index: {}]   ;;  %s3865_s1 = inlined_call_operand.vmem [shape: bf16[2,32,96], index: 1, kind: input, shape index: {}]   ;;  %s3866_s2 = inlined_call_operand.vmem [shape: bf16[2,32,64], index: 2, kind: input, shape index: {}]   ;;  %s3867_s3 = inlined_call_operand.vmem [shape: bf16[2,64,32], index: 3, kind: input, shape index: {}]   ;;  %s3868_s4 = inlined_call_operand.vmem [shape: f32[2,7,96], index: 4, kind: input, shape index: {}]   ;;  %s3869_s5 = inlined_call_operand.vmem [shape: bf16[32,32], index: 5, kind: input, shape index: {}]   ;;  %s3870_s6 = inlined_call_operand.vmem [shape: bf16[32,3], index: 6, kind: input, shape index: {}]   ;;  %s3871_s7 = inlined_call_operand.vmem [shape: f32[2,32], index: 7, kind: input, shape index: {}]   ;;  %s3872_s8 = inlined_call_operand.hbm [shape: f32[2,3], index: 8, kind: output, shape index: {}]  }
   0x1   :  { %v3289_v0 = vld [vmem:[%s3864_s0] sm:$0xff]  ;;  %v3294_v1 = vld [vmem:[%s3864_s0 + $0x8] sm:$0xff] }
   0x2   :  { %v36_v2 = vsel %vm35_vm0, %v3289_v0, 0.0  ;;  %v39_v3 = vsel %vm35_vm0, %v3294_v1, 0.0 }
   0x3   :  { %37 = vadd.xlane.f32.xlu0 %v36_v2 }
   0x7   :  { %40 = vadd.xlane.f32.xlu0 %v39_v3 }
   0x8   :  { %13 = vsyncpa [#allocation4], 0  ;;  %v3100_v14 = vld [vmem:[%s3865_s1] sm:$0xff]   ;;  %v3224_v15 = vmov 0.0   ;;  %vm3225_vm1 = vmmov 0   ;;  %v3101_v16 = vld [vmem:[%s3865_s1 + $0x8] sm:$0xff]   ;;  %v63_v21 = vlaneseq }
   0x9   :  { %2819 = vmatprep.subr.bf16.mxu0 %v3224_v15  ;;  %2823 = vmatprep.mubr.msk.bf16.mxu0 %vm3225_vm1, %v3224_v15  ;;  %v3324_v26 = vld [vmem:[%s3868_s4] sm:$0x7f]  ;;  %s3226_s14 = smov 96   ;;  %vm145_vm2 = vcmask 64512   ;;  %s3227_s15 = smov 64   ;;  %vm272_vm3 = vcmask 1043456  }
   0xa   :  { %2820 = vmatpush3.bf16.msra.mxu0 %v3100_v14  ;;  %2827 = vmatprep.subr.bf16.mxu1 %v3224_v15  ;;  %v3318_v24 = vshrl.u32 %v63_v21, 7  ;;  %s3228_s16 = smov 88   ;;  %s3229_s17 = smov 120   ;;  %vm596_vm4 = vcmask 130112   ;;  %vm829_vm5 = vcmask 195712   ;;  %vm1062_vm6 = vcmask 261312  }
   0xb   :  { %2821 = vmatprep.subr.bf16.mxu0 %v3224_v15  ;;  %2829 = vmatprep.mubr.msk.bf16.mxu1 %vm3225_vm1, %v3224_v15  ;;  %s3230_s18 = smov 56   ;;  %s3231_s19 = smov 80   ;;  %vm1207_vm7 = vcmask 523264   ;;  %vm2512_vm8 = vcmask 1041409   ;;  %vm2635_vm9 = vcmask 17408  }
   0xc   :  { %v65_v25 = vsub.s32 3, %v3318_v24  ;;  %v71_v30 = vsub.s32 4, %v3318_v24  ;;  %v3337_v39 = vsub.s32 0, %v3318_v24  ;;  %s3232_s20 = smov 112   ;;  %s3233_s21 = smov 48  }
   0xd   :  { %s3234_s22 = smov 72   ;;  %s3235_s23 = smov 104  }
   0xe   :  { %2822 = vmatpush3.bf16.msra.mxu0 %v3101_v16  ;;  %v66_v29 = vrot.slane %v3324_v26, %v65_v25  ;;  %v72_v34 = vrot.slane %v3324_v26, %v71_v30  ;;  %v83_v40 = vrot.slane %v3324_v26, %v3337_v39  ;;  %s3236_s24 = smov 40   ;;  %s3237_s25 = smov 8  }
   0xf   :  { %2833 = vmatprep.subr.bf16.mxu0 %v3224_v15  ;;  %s3238_s26 = smov 16   ;;  %s3239_s27 = smov 24  }
  0x10   :  { %s3240_s0 = smov [#allocation3]  }
  0x90   :  { %v38_v4 = vpop.xlane.xlu0 %37 }
  0x91   :  { %v43_v5 = vmul.f32 0.03125, %v38_v4 }
  0x93   :  { %v45_v6 = vsub.f32 %v3289_v0, %v43_v5 }
  0x94   :  { %v41_v7 = vpop.xlane.xlu0 %40 }
  0x95   :  { %v44_v8 = vmul.f32 0.03125, %v41_v7  ;;  %v47_v9 = vmul.f32 %v45_v6, %v45_v6 }
  0x97   :  { %v46_v10 = vsub.f32 %v3294_v1, %v44_v8  ;;  %v49_v11 = vsel %vm35_vm0, %v47_v9, 0.0 }
  0x98   :  { %50 = vadd.xlane.f32.xlu1 %v49_v11 }
  0x99   :  { %v48_v12 = vmul.f32 %v46_v10, %v46_v10 }
  0x9b   :  { %v52_v13 = vsel %vm35_vm0, %v48_v12, 0.0 }
  0x9c   :  { %53 = vadd.xlane.f32.xlu1 %v52_v13 }
 0x125   :  { %v51_v17 = vpop.xlane.xlu1 %50 }
 0x126   :  { %v55_v18 = vmul.f32 0.03125, %v51_v17 }
 0x128   :  { %v57_v19 = vadd.f32 1e-05, %v55_v18 }
 0x129   :  { %v54_v20 = vpop.xlane.xlu1 %53 }
 0x12a   :  { %3120 = vrsqrt.f32 %v57_v19  ;;  %v56_v22 = vmul.f32 0.03125, %v54_v20 }
 0x12c   :  { %v58_v23 = vadd.f32 1e-05, %v56_v22 }
 0x12e   :  { %3122 = vrsqrt.f32 %v58_v23 }
 0x134   :  { %v3121_v27 = vpop.eup %3120 }
 0x135   :  { %v61_v28 = vmul.f32 %v3121_v27, %v45_v6 }
 0x137   :  { %v67_v33 = vmul.f32 %v66_v29, %v61_v28 }
 0x138   :  { %v3123_v31 = vpop.eup %3122 }
 0x139   :  { %v62_v32 = vmul.f32 %v3123_v31, %v46_v10  ;;  %v73_v36 = vadd.f32 %v72_v34, %v67_v33 }
 0x13b   :  { %v68_v35 = vmul.f32 %v66_v29, %v62_v32 }
 0x13d   :  { %v74_v37 = vadd.f32 %v72_v34, %v68_v35 }
 0x13f   :  { %v79_v38 = vpack.c.bf16 %v74_v37, %v73_v36 }
 0x141   :  { %2824 = vmatmul.mubr.msk.bf16.vlgmr.msra.gmra.mrb[0].mxu0 %vm35_vm0, %v79_v38 }
 0x142   :  { %2835 = vmatprep.mubr.msk.bf16.mxu0 %vm3225_vm1, %v3224_v15 }
 0x214   :  { %v133_v41 = vpop.f32.mrb[0].mxu0 }
 0x215   :  { %v134_v42 = vadd.f32 %v133_v41, %v83_v40  ;;  %v2825_v43 = vpop.f32.mrb[1].mxu0 }
 0x216   :  { %v136_v44 = vpop.f32.mrb[2].mxu0 }
 0x217   :  { %v3341_v45 = vpack.c.bf16 %v134_v42, %v134_v42  ;;  %v137_v46 = vadd.f32 %v136_v44, %v83_v40  ;;  %v2826_v47 = vpop.f32.mrb[3].mxu0 }
 0x219   :  { %v3343_v48 = vpack.c.bf16 %v137_v46, %v137_v46  ;;  %143 = vrot.lane.b32.xlu0 %v3341_v45, %s3226_s14 }
 0x21b   :  { %193 = vrot.lane.b32.xlu1 %v3343_v48, %s3226_s14 }
 0x28b   :  { %v144_v49 = vpop.permute.xlu0 %143 }
 0x28c   :  { %v150_v50 = vsel %vm145_vm2, %v144_v49, 0 }
 0x28d   :  { %2828 = vmatpush3.bf16.xpose.msra.mxu1 %v150_v50  ;;  %v194_v51 = vpop.permute.xlu1 %193 }
 0x28e   :  { %v199_v52 = vsel %vm145_vm2, %v194_v51, 0  ;;  %2839 = vmatprep.subr.bf16.mxu1 %v3224_v15 }
 0x28f   :  { %2834 = vmatpush3.bf16.xpose.msra.mxu0 %v199_v52 }
 0x290   :  { %2845 = vmatprep.subr.bf16.mxu0 %v3224_v15 }
 0x294   :  { %2830 = vmatmul.mubr.msk.bf16.vlgmr.msra.gmra.mrb[0].mxu1 %vm145_vm2, %v3341_v45 }
 0x295   :  { %2841 = vmatprep.mubr.msk.bf16.mxu1 %vm3225_vm1, %v3224_v15 }
 0x296   :  { %2836 = vmatmul.mubr.msk.bf16.vlgmr.msra.gmra.mrb[4].mxu0 %vm145_vm2, %v3343_v48 }
 0x297   :  { %2847 = vmatprep.mubr.msk.bf16.mxu0 %vm3225_vm1, %v3224_v15 }
 0x367   :  { %v186_v53 = vpop.f32.mrb[0].mxu1 }
 0x368   :  { %v241_v54 = vmul.f32 0.35355338, %v186_v53  ;;  %v2831_v55 = vpop.f32.mrb[1].mxu1 }
 0x369   :  { %v189_v56 = vpop.f32.mrb[2].mxu1  ;;  %v235_v57 = vpop.f32.mrb[4].mxu0 }
 0x36a   :  { %v242_v58 = vmul.f32 0.35355338, %v235_v57  ;;  %v2832_v59 = vpop.f32.mrb[3].mxu1  ;;  %v2837_v60 = vpop.f32.mrb[5].mxu0  ;;  %v243_v61 = vsel %vm145_vm2, %v241_v54, -inf }
 0x36b   :  { %244 = vmax.xlane.f32.xlu1 %v243_v61  ;;  %v238_v62 = vpop.f32.mrb[6].mxu0 }
 0x36c   :  { %v2838_v63 = vpop.f32.mrb[7].mxu0  ;;  %v246_v2 = vsel %vm145_vm2, %v242_v58, -inf }
 0x36d   :  { %247 = vmax.xlane.f32.xlu0 %v246_v2 }
 0x37c   :  { %316 = vrot.lane.b32.xlu1 %v3343_v48, %s3227_s15 }
 0x380   :  { %368 = vrot.lane.b32.xlu1 %v3341_v45, %s3228_s16 }
 0x3f8   :  { %v245_v3 = vpop.xlane.xlu1 %244 }
 0x3f9   :  { %v249_v4 = vsub.f32 %v241_v54, %v245_v3 }
 0x3fa   :  { %v248_v5 = vpop.xlane.xlu0 %247 }
 0x3fb   :  { %v251_v6 = vmul.f32 1.442695, %v249_v4  ;;  %v250_v7 = vsub.f32 %v242_v58, %v248_v5 }
 0x3fc   :  { %v317_v8 = vpop.permute.xlu1 %316 }
 0x3fd   :  { %3124 = vpow2.f32 %v251_v6  ;;  %v253_v9 = vmul.f32 1.442695, %v250_v7  ;;  %v322_v10 = vsel %vm272_vm3, %v317_v8, 0 }
 0x3fe   :  { %2846 = vmatpush3.bf16.msra.mxu0 %v322_v10 }
 0x3ff   :  { %3126 = vpow2.f32 %v253_v9  ;;  %2857 = vmatprep.subr.bf16.mxu0 %v3224_v15 }
 0x400   :  { %v369_v16 = vpop.permute.xlu1 %368 }
 0x401   :  { %v374_v31 = vsel %vm145_vm2, %v369_v16, 0 }
 0x407   :  { %v3125_v11 = vpop.eup %3124 }
 0x408   :  { %v255_v12 = vsel %vm145_vm2, %v3125_v11, 0.0 }
 0x409   :  { %v3127_v13 = vpop.eup %3126  ;;  %256 = vadd.xlane.f32.xlu0 %v255_v12 }
 0x40a   :  { %v258_v14 = vsel %vm145_vm2, %v3127_v13, 0.0 }
 0x40b   :  { %259 = vadd.xlane.f32.xlu1 %v258_v14 }
 0x41c   :  { %418 = vrot.lane.b32.xlu1 %v3343_v48, %s3228_s16 }
 0x41f   :  { %267 = vrot.lane.b32.xlu0 %v3341_v45, %s3227_s15 }
 0x420   :  { %416 = vrot.lane.b32.xlu1 %v3343_v48, %s3229_s17 }
 0x423   :  { %366 = vrot.lane.b32.xlu0 %v3341_v45, %s3229_s17 }
 0x496   :  { %v257_v17 = vpop.xlane.xlu0 %256 }
 0x497   :  { %3128 = vrcp.f32 %v257_v17 }
 0x498   :  { %v260_v18 = vpop.xlane.xlu1 %259 }
 0x499   :  { %3130 = vrcp.f32 %v260_v18 }
 0x49a   :  { %v268_v19 = vpop.permute.xlu0 %267 }
 0x49b   :  { %v274_v20 = vsel %vm272_vm3, %v268_v19, 0 }
 0x49c   :  { %2840 = vmatpush3.bf16.msra.mxu1 %v274_v20  ;;  %v419_v29 = vpop.permute.xlu1 %418 }
 0x49d   :  { %2851 = vmatprep.subr.bf16.mxu1 %v3224_v15  ;;  %v424_v33 = vsel %vm145_vm2, %v419_v29, 0 }
 0x49e   :  { %v367_v34 = vpop.permute.xlu0 %366 }
 0x4a0   :  { %v417_v35 = vpop.permute.xlu1 %416 }
 0x4a1   :  { %v3129_v21 = vpop.eup %3128 }
 0x4a2   :  { %v263_v22 = vmul.f32 %v3129_v21, %v3125_v11 }
 0x4a3   :  { %v3131_v23 = vpop.eup %3130 }
 0x4a4   :  { %v264_v27 = vmul.f32 %v3131_v23, %v3127_v13  ;;  %v265_v28 = vpack.c.bf16 %v263_v22, %v263_v22 }
 0x4a6   :  { %2842 = vmatmul.mubr.msk.bf16.vlgmr.msra.gmra.mrb[4].mxu1 %vm145_vm2, %v265_v28  ;;  %v266_v32 = vpack.c.bf16 %v264_v27, %v264_v27 }
 0x4a7   :  { %2852 = vmatpush3.bf16.xpose.msra.mxu1 %v374_v31  ;;  %2853 = vmatprep.mubr.msk.bf16.mxu1 %vm3225_vm1, %v3224_v15 }
 0x4a8   :  { %2848 = vmatmul.mubr.msk.bf16.vlgmr.msra.gmra.mrb[8].mxu0 %vm145_vm2, %v266_v32  ;;  %2863 = vmatprep.subr.bf16.mxu1 %v3224_v15 }
 0x4a9   :  { %2858 = vmatpush3.bf16.xpose.msra.mxu0 %v424_v33  ;;  %2859 = vmatprep.mubr.msk.bf16.mxu0 %vm3225_vm1, %v3224_v15 }
 0x4aa   :  { %2869 = vmatprep.subr.bf16.mxu0 %v3224_v15 }
 0x4ae   :  { %2854 = vmatmul.mubr.msk.bf16.vlgmr.msra.gmra.mrb[8].mxu1 %vm145_vm2, %v367_v34 }
 0x4af   :  { %2865 = vmatprep.mubr.msk.bf16.mxu1 %vm3225_vm1, %v3224_v15 }
 0x4b0   :  { %2860 = vmatmul.mubr.msk.bf16.vlgmr.msra.gmra.mrb[12].mxu0 %vm145_vm2, %v417_v35 }
 0x4b1   :  { %2871 = vmatprep.mubr.msk.bf16.mxu0 %vm3225_vm1, %v3224_v15 }
 0x579   :  { %v310_v36 = vpop.f32.mrb[4].mxu1 }
 0x57a   :  { %364 = vst.msk [vmem:[#allocation2] sm:$0xff] %vm145_vm2, %v310_v36  ;;  %v2843_v37 = vpop.f32.mrb[5].mxu1 }
 0x57b   :  { %v313_v38 = vpop.f32.mrb[6].mxu1  ;;  %v358_v40 = vpop.f32.mrb[8].mxu0 }
 0x57c   :  { %365 = vst.msk [vmem:[#allocation2 + $0x8] sm:$0xff] %vm145_vm2, %v358_v40  ;;  %v2844_v41 = vpop.f32.mrb[7].mxu1  ;;  %v2849_v42 = vpop.f32.mrb[9].mxu0 }
 0x57d   :  { %v361_v43 = vpop.f32.mrb[10].mxu0 }
 0x57e   :  { %v2850_v44 = vpop.f32.mrb[11].mxu0 }
 0x581   :  { %v410_v46 = vpop.f32.mrb[8].mxu1 }
 0x582   :  { %v466_v47 = vmul.f32 0.35355338, %v410_v46  ;;  %v2855_v49 = vpop.f32.mrb[9].mxu1 }
 0x583   :  { %v413_v50 = vpop.f32.mrb[10].mxu1  ;;  %v460_v51 = vpop.f32.mrb[12].mxu0 }
 0x584   :  { %v467_v52 = vmul.f32 0.35355338, %v460_v51  ;;  %v2856_v53 = vpop.f32.mrb[11].mxu1  ;;  %v2861_v54 = vpop.f32.mrb[13].mxu0  ;;  %v468_v55 = vsel %vm145_vm2, %v466_v47, -inf }
 0x585   :  { %469 = vmax.xlane.f32.xlu0 %v468_v55  ;;  %v463_v56 = vpop.f32.mrb[14].mxu0 }
 0x586   :  { %v2862_v57 = vpop.f32.mrb[15].mxu0  ;;  %v471_v58 = vsel %vm145_vm2, %v467_v52, -inf }
 0x587   :  { %472 = vmax.xlane.f32.xlu1 %v471_v58 }
 0x598   :  { %540 = vrot.lane.b32.xlu1 %v3343_v48, %s3230_s18 }
 0x59c   :  { %601 = vrot.lane.b32.xlu1 %v3341_v45, %s3231_s19 }
 0x5a0   :  { %651 = vrot.lane.b32.xlu1 %v3343_v48, %s3231_s19 }
 0x5a4   :  { %649 = vrot.lane.b32.xlu1 %v3343_v48, %s3232_s20 }
 0x612   :  { %v470_v59 = vpop.xlane.xlu0 %469 }
 0x613   :  { %v474_v60 = vsub.f32 %v466_v47, %v470_v59 }
 0x614   :  { %v473_v61 = vpop.xlane.xlu1 %472 }
 0x615   :  { %v476_v62 = vmul.f32 1.442695, %v474_v60  ;;  %v475_v63 = vsub.f32 %v467_v52, %v473_v61 }
 0x617   :  { %3132 = vpow2.f32 %v476_v62  ;;  %v478_v2 = vmul.f32 1.442695, %v475_v63 }
 0x618   :  { %v541_v3 = vpop.permute.xlu1 %540 }
 0x619   :  { %3134 = vpow2.f32 %v478_v2  ;;  %v546_v4 = vsel %vm272_vm3, %v541_v3, 0 }
 0x61a   :  { %2870 = vmatpush3.bf16.msra.mxu0 %v546_v4 }
 0x61b   :  { %2881 = vmatprep.subr.bf16.mxu0 %v3224_v15 }
 0x61c   :  { %v602_v14 = vpop.permute.xlu1 %601 }
 0x61d   :  { %v607_v21 = vsel %vm145_vm2, %v602_v14, 0 }
 0x620   :  { %v652_v20 = vpop.permute.xlu1 %651 }
 0x621   :  { %v3133_v5 = vpop.eup %3132  ;;  %v657_v23 = vsel %vm145_vm2, %v652_v20, 0 }
 0x622   :  { %v480_v6 = vsel %vm145_vm2, %v3133_v5, 0.0 }
 0x623   :  { %v3135_v7 = vpop.eup %3134  ;;  %481 = vadd.xlane.f32.xlu0 %v480_v6 }
 0x624   :  { %v483_v8 = vsel %vm145_vm2, %v3135_v7, 0.0  ;;  %v650_v28 = vpop.permute.xlu1 %649 }
 0x627   :  { %484 = vadd.xlane.f32.xlu0 %v483_v8 }
 0x63d   :  { %492 = vrot.lane.b32.xlu0 %v3341_v45, %s3230_s18 }
 0x641   :  { %599 = vrot.lane.b32.xlu0 %v3341_v45, %s3232_s20 }
 0x6b0   :  { %v482_v9 = vpop.xlane.xlu0 %481 }
 0x6b1   :  { %3136 = vrcp.f32 %v482_v9 }
 0x6b4   :  { %v485_v10 = vpop.xlane.xlu0 %484 }
 0x6b5   :  { %3138 = vrcp.f32 %v485_v10 }
 0x6b8   :  { %v493_v11 = vpop.permute.xlu0 %492 }
 0x6b9   :  { %v498_v12 = vsel %vm272_vm3, %v493_v11, 0 }
 0x6ba   :  { %2864 = vmatpush3.bf16.msra.mxu1 %v498_v12 }
 0x6bb   :  { %v3137_v13 = vpop.eup %3136  ;;  %2875 = vmatprep.subr.bf16.mxu1 %v3224_v15 }
 0x6bc   :  { %v488_v16 = vmul.f32 %v3137_v13, %v3133_v5  ;;  %v600_v27 = vpop.permute.xlu0 %599 }
 0x6be   :  { %v490_v17 = vpack.c.bf16 %v488_v16, %v488_v16 }
 0x6bf   :  { %v3139_v18 = vpop.eup %3138 }
 0x6c0   :  { %v489_v19 = vmul.f32 %v3139_v18, %v3135_v7  ;;  %2866 = vmatmul.mubr.msk.bf16.vlgmr.msra.gmra.mrb[12].mxu1 %vm145_vm2, %v490_v17 }
 0x6c1   :  { %2877 = vmatprep.mubr.msk.bf16.mxu1 %vm3225_vm1, %v3224_v15 }
 0x6c2   :  { %v491_v22 = vpack.c.bf16 %v489_v19, %v489_v19 }
 0x6c3   :  { %2876 = vmatpush3.bf16.xpose.msra.mxu1 %v607_v21 }
 0x6c4   :  { %2872 = vmatmul.mubr.msk.bf16.vlgmr.msra.gmra.mrb[16].mxu0 %vm145_vm2, %v491_v22  ;;  %2887 = vmatprep.subr.bf16.mxu1 %v3224_v15 }
 0x6c5   :  { %2882 = vmatpush3.bf16.xpose.msra.mxu0 %v657_v23  ;;  %2883 = vmatprep.mubr.msk.bf16.mxu0 %vm3225_vm1, %v3224_v15 }
 0x6c6   :  { %2893 = vmatprep.subr.bf16.mxu0 %v3224_v15 }
 0x6ca   :  { %2878 = vmatmul.mubr.msk.bf16.vlgmr.msra.gmra.mrb[16].mxu1 %vm145_vm2, %v600_v27 }
 0x6cb   :  { %2889 = vmatprep.mubr.msk.bf16.mxu1 %vm3225_vm1, %v3224_v15 }
 0x6cc   :  { %2884 = vmatmul.mubr.msk.bf16.vlgmr.msra.gmra.mrb[20].mxu0 %vm145_vm2, %v650_v28 }
 0x6cd   :  { %2895 = vmatprep.mubr.msk.bf16.mxu0 %vm3225_vm1, %v3224_v15 }
 0x793   :  { %v3435_v29 = vpop.f32.mrb[12].mxu1 }
 0x794   :  { %v2867_v31 = vpop.f32.mrb[13].mxu1 }
 0x795   :  { %v537_v32 = vpop.f32.mrb[14].mxu1 }
 0x796   :  { %v2868_v33 = vpop.f32.mrb[15].mxu1 }
 0x797   :  { %v3437_v34 = vpop.f32.mrb[16].mxu0 }
 0x798   :  { %v2873_v35 = vpop.f32.mrb[17].mxu0 }
 0x799   :  { %v585_v36 = vpop.f32.mrb[18].mxu0 }
 0x79a   :  { %v2874_v37 = vpop.f32.mrb[19].mxu0 }
 0x79d   :  { %v643_v38 = vpop.f32.mrb[16].mxu1 }
 0x79e   :  { %v699_v40 = vmul.f32 0.35355338, %v643_v38  ;;  %v2879_v41 = vpop.f32.mrb[17].mxu1 }
 0x79f   :  { %v646_v42 = vpop.f32.mrb[18].mxu1  ;;  %v693_v43 = vpop.f32.mrb[20].mxu0 }
 0x7a0   :  { %v700_v44 = vmul.f32 0.35355338, %v693_v43  ;;  %v2880_v46 = vpop.f32.mrb[19].mxu1  ;;  %v2885_v47 = vpop.f32.mrb[21].mxu0  ;;  %v701_v49 = vsel %vm145_vm2, %v699_v40, -inf }
 0x7a1   :  { %702 = vmax.xlane.f32.xlu0 %v701_v49  ;;  %v696_v50 = vpop.f32.mrb[22].mxu0 }
 0x7a2   :  { %v2886_v51 = vpop.f32.mrb[23].mxu0  ;;  %v704_v52 = vsel %vm145_vm2, %v700_v44, -inf }
 0x7a3   :  { %705 = vmax.xlane.f32.xlu1 %v704_v52 }
 0x7b4   :  { %773 = vrot.lane.b32.xlu1 %v3343_v48, %s3233_s21 }
 0x7b8   :  { %834 = vrot.lane.b32.xlu1 %v3341_v45, %s3234_s22 }
 0x7bc   :  { %884 = vrot.lane.b32.xlu1 %v3343_v48, %s3234_s22 }
 0x7c0   :  { %882 = vrot.lane.b32.xlu1 %v3343_v48, %s3235_s23 }
 0x82e   :  { %v703_v53 = vpop.xlane.xlu0 %702 }
 0x82f   :  { %v707_v54 = vsub.f32 %v699_v40, %v703_v53 }
 0x830   :  { %v706_v55 = vpop.xlane.xlu1 %705 }
 0x831   :  { %v709_v56 = vmul.f32 1.442695, %v707_v54  ;;  %v708_v57 = vsub.f32 %v700_v44, %v706_v55 }
 0x833   :  { %3140 = vpow2.f32 %v709_v56  ;;  %v711_v58 = vmul.f32 1.442695, %v708_v57 }
 0x834   :  { %v774_v59 = vpop.permute.xlu1 %773 }
 0x835   :  { %3142 = vpow2.f32 %v711_v58  ;;  %v779_v60 = vsel %vm272_vm3, %v774_v59, 0 }
 0x836   :  { %2894 = vmatpush3.bf16.msra.mxu0 %v779_v60 }
 0x837   :  { %2905 = vmatprep.subr.bf16.mxu0 %v3224_v15 }
 0x838   :  { %v835_v8 = vpop.permute.xlu1 %834 }
 0x839   :  { %v840_v14 = vsel %vm145_vm2, %v835_v8, 0 }
 0x83c   :  { %v885_v13 = vpop.permute.xlu1 %884 }
 0x83d   :  { %v3141_v61 = vpop.eup %3140  ;;  %v890_v17 = vsel %vm145_vm2, %v885_v13, 0 }
 0x83e   :  { %v713_v62 = vsel %vm145_vm2, %v3141_v61, 0.0 }
 0x83f   :  { %v3143_v63 = vpop.eup %3142  ;;  %714 = vadd.xlane.f32.xlu0 %v713_v62 }
 0x840   :  { %v716_v2 = vsel %vm145_vm2, %v3143_v63, 0.0  ;;  %v883_v19 = vpop.permute.xlu1 %882 }
 0x843   :  { %717 = vadd.xlane.f32.xlu0 %v716_v2 }
 0x859   :  { %725 = vrot.lane.b32.xlu0 %v3341_v45, %s3233_s21 }
 0x85d   :  { %832 = vrot.lane.b32.xlu0 %v3341_v45, %s3235_s23 }
 0x8cc   :  { %v715_v3 = vpop.xlane.xlu0 %714 }
 0x8cd   :  { %3144 = vrcp.f32 %v715_v3 }
 0x8d0   :  { %v718_v4 = vpop.xlane.xlu0 %717 }
 0x8d1   :  { %3146 = vrcp.f32 %v718_v4 }
 0x8d4   :  { %v726_v5 = vpop.permute.xlu0 %725 }
 0x8d5   :  { %v731_v6 = vsel %vm272_vm3, %v726_v5, 0 }
 0x8d6   :  { %2888 = vmatpush3.bf16.msra.mxu1 %v731_v6 }
 0x8d7   :  { %v3145_v7 = vpop.eup %3144  ;;  %2899 = vmatprep.subr.bf16.mxu1 %v3224_v15 }
 0x8d8   :  { %v721_v9 = vmul.f32 %v3145_v7, %v3141_v61  ;;  %v833_v18 = vpop.permute.xlu0 %832 }
 0x8da   :  { %v723_v10 = vpack.c.bf16 %v721_v9, %v721_v9 }
 0x8db   :  { %v3147_v11 = vpop.eup %3146 }
 0x8dc   :  { %v722_v12 = vmul.f32 %v3147_v11, %v3143_v63  ;;  %2890 = vmatmul.mubr.msk.bf16.vlgmr.msra.gmra.mrb[20].mxu1 %vm145_vm2, %v723_v10 }
 0x8dd   :  { %2901 = vmatprep.mubr.msk.bf16.mxu1 %vm3225_vm1, %v3224_v15 }
 0x8de   :  { %v724_v16 = vpack.c.bf16 %v722_v12, %v722_v12 }
 0x8df   :  { %2900 = vmatpush3.bf16.xpose.msra.mxu1 %v840_v14 }
 0x8e0   :  { %2896 = vmatmul.mubr.msk.bf16.vlgmr.msra.gmra.mrb[24].mxu0 %vm145_vm2, %v724_v16  ;;  %2911 = vmatprep.subr.bf16.mxu1 %v3224_v15 }
 0x8e1   :  { %2906 = vmatpush3.bf16.xpose.msra.mxu0 %v890_v17  ;;  %2907 = vmatprep.mubr.msk.bf16.mxu0 %vm3225_vm1, %v3224_v15 }
 0x8e2   :  { %2917 = vmatprep.subr.bf16.mxu0 %v3224_v15 }
 0x8e6   :  { %2902 = vmatmul.mubr.msk.bf16.vlgmr.msra.gmra.mrb[24].mxu1 %vm145_vm2, %v833_v18 }
 0x8e7   :  { %2913 = vmatprep.mubr.msk.bf16.mxu1 %vm3225_vm1, %v3224_v15 }
 0x8e8   :  { %2908 = vmatmul.mubr.msk.bf16.vlgmr.msra.gmra.mrb[28].mxu0 %vm145_vm2, %v883_v19 }
 0x8e9   :  { %2919 = vmatprep.mubr.msk.bf16.mxu0 %vm3225_vm1, %v3224_v15 }
 0x9af   :  { %v767_v20 = vpop.f32.mrb[20].mxu1 }
 0x9b0   :  { %v2891_v21 = vpop.f32.mrb[21].mxu1 }
 0x9b1   :  { %v770_v22 = vpop.f32.mrb[22].mxu1 }
 0x9b2   :  { %v2892_v23 = vpop.f32.mrb[23].mxu1 }
 0x9b3   :  { %v815_v27 = vpop.f32.mrb[24].mxu0 }
 0x9b4   :  { %v2897_v28 = vpop.f32.mrb[25].mxu0 }
 0x9b5   :  { %v818_v31 = vpop.f32.mrb[26].mxu0 }
 0x9b6   :  { %v2898_v32 = vpop.f32.mrb[27].mxu0 }
 0x9b9   :  { %v876_v33 = vpop.f32.mrb[24].mxu1 }
 0x9ba   :  { %v932_v35 = vmul.f32 0.35355338, %v876_v33  ;;  %v2903_v36 = vpop.f32.mrb[25].mxu1 }
 0x9bb   :  { %v879_v37 = vpop.f32.mrb[26].mxu1  ;;  %v926_v38 = vpop.f32.mrb[28].mxu0 }
 0x9bc   :  { %v933_v40 = vmul.f32 0.35355338, %v926_v38  ;;  %v2904_v41 = vpop.f32.mrb[27].mxu1  ;;  %v2909_v42 = vpop.f32.mrb[29].mxu0  ;;  %v934_v43 = vsel %vm145_vm2, %v932_v35, -inf }
 0x9bd   :  { %935 = vmax.xlane.f32.xlu0 %v934_v43  ;;  %v929_v44 = vpop.f32.mrb[30].mxu0  ;;  %v3102_v41 = vld [vmem:[%s3866_s2] sm:$0xff]   ;;  %v3103_v42 = vld [vmem:[%s3866_s2 + $0x8] sm:$0xff]  }
 0x9be   :  { %v2910_v46 = vpop.f32.mrb[31].mxu0  ;;  %v937_v47 = vsel %vm145_vm2, %v933_v40, -inf  ;;  %v3104_v43 = vld [vmem:[%s3867_s3] sm:$0xff]   ;;  %v3105_v44 = vld [vmem:[%s3867_s3 + $0x8] sm:$0xff]  }
 0x9bf   :  { %938 = vmax.xlane.f32.xlu1 %v937_v47 }
 0x9d0   :  { %1006 = vrot.lane.b32.xlu1 %v3343_v48, %s3236_s24 }
 0x9d4   :  { %590 = vrot.lane.b32.xlu1 %v3435_v29, %s3237_s25 }
 0x9d8   :  { %592 = vrot.lane.b32.xlu1 %v3437_v34, %s3237_s25 }
 0x9dc   :  { %825 = vrot.lane.b32.xlu1 %v815_v27, %s3238_s26 }
 0xa4a   :  { %v936_v49 = vpop.xlane.xlu0 %935 }
 0xa4b   :  { %v940_v50 = vsub.f32 %v932_v35, %v936_v49 }
 0xa4c   :  { %v939_v51 = vpop.xlane.xlu1 %938 }
 0xa4d   :  { %v942_v52 = vmul.f32 1.442695, %v940_v50  ;;  %v941_v53 = vsub.f32 %v933_v40, %v939_v51 }
 0xa4f   :  { %3148 = vpow2.f32 %v942_v52  ;;  %v944_v54 = vmul.f32 1.442695, %v941_v53  ;;  %v1097_v53 = vsub.s32 5, %v3318_v24 }
 0xa50   :  { %v1007_v55 = vpop.permute.xlu1 %1006 }
 0xa51   :  { %3150 = vpow2.f32 %v944_v54  ;;  %v1012_v48 = vsel %vm272_vm3, %v1007_v55, 0  ;;  %v1098_v55 = vrot.slane %v3324_v26, %v1097_v53 }
 0xa52   :  { %2918 = vmatpush3.bf16.msra.mxu0 %v1012_v48 }
 0xa53   :  { %2931 = vmatprep.subr.bf16.mxu0 %v3224_v15 }
 0xa54   :  { %v591_v29 = vpop.permute.xlu1 %590 }
 0xa55   :  { %597 = vst.msk [vmem:[#allocation2] sm:$0xff] %vm596_vm4, %v591_v29  ;;  %v1103_v29 = vsub.s32 6, %v3318_v24 }
 0xa58   :  { %v593_v34 = vpop.permute.xlu1 %592 }
 0xa59   :  { %v3149_v56 = vpop.eup %3148  ;;  %598 = vst.msk [vmem:[#allocation2 + $0x8] sm:$0xff] %vm596_vm4, %v593_v34 }
 0xa5a   :  { %v946_v57 = vsel %vm145_vm2, %v3149_v56, 0.0 }
 0xa5b   :  { %v3151_v58 = vpop.eup %3150  ;;  %947 = vadd.xlane.f32.xlu0 %v946_v57 }
 0xa5c   :  { %v826_v59 = vpop.permute.xlu1 %825  ;;  %v949_v60 = vsel %vm145_vm2, %v3151_v58, 0.0 }
 0xa5d   :  { %831 = vst.msk [vmem:[#allocation2 + $0x8] sm:$0xff] %vm829_vm5, %v826_v59 }
 0xa5f   :  { %950 = vadd.xlane.f32.xlu0 %v949_v60 }
 0xa75   :  { %958 = vrot.lane.b32.xlu0 %v3341_v45, %s3236_s24 }
 0xa79   :  { %823 = vrot.lane.b32.xlu0 %v767_v20, %s3238_s26 }
 0xae8   :  { %v948_v61 = vpop.xlane.xlu0 %947 }
 0xae9   :  { %3152 = vrcp.f32 %v948_v61 }
 0xaec   :  { %v951_v62 = vpop.xlane.xlu0 %950 }
 0xaed   :  { %3154 = vrcp.f32 %v951_v62 }
 0xaf0   :  { %v959_v63 = vpop.permute.xlu0 %958 }
 0xaf1   :  { %v964_v2 = vsel %vm272_vm3, %v959_v63, 0  ;;  %v3106_v63 = vld [vmem:[%s3867_s3 + $0x10] sm:$0xff]  }
 0xaf2   :  { %2912 = vmatpush3.bf16.msra.mxu1 %v964_v2  ;;  %v3107_v2 = vld [vmem:[%s3867_s3 + $0x18] sm:$0xff]  }
 0xaf3   :  { %v3153_v3 = vpop.eup %3152  ;;  %2923 = vmatprep.subr.bf16.mxu1 %v3224_v15 }
 0xaf4   :  { %v954_v4 = vmul.f32 %v3153_v3, %v3149_v56  ;;  %v824_v5 = vpop.permute.xlu0 %823  ;;  %v3557_v3 = vsub.s32 1, %v3318_v24 }
 0xaf5   :  { %830 = vst.msk [vmem:[#allocation2] sm:$0xff] %vm829_vm5, %v824_v5 }
 0xaf6   :  { %v956_v6 = vpack.c.bf16 %v954_v4, %v954_v4  ;;  %v1115_v4 = vrot.slane %v3324_v26, %v3557_v3 }
 0xaf7   :  { %v3155_v7 = vpop.eup %3154 }
 0xaf8   :  { %v955_v45 = vmul.f32 %v3155_v7, %v3151_v58  ;;  %2914 = vmatmul.mubr.msk.bf16.vlgmr.msra.gmra.mrb[28].mxu1 %vm145_vm2, %v956_v6  ;;  %v1104_v58 = vrot.slane %v3324_v26, %v1103_v29 }
 0xaf9   :  { %2927 = vmatprep.mubr.msk.bf16.mxu1 %vm3225_vm1, %v3224_v15  ;;  %2924 = vmatpush3.bf16.msra.mxu1 %v3102_v41  ;;  %v3109_v41 = vld [vmem:[%s3865_s1 + $0x18] sm:$0xff]  }
 0xafa   :  { %v957_v8 = vpack.c.bf16 %v955_v45, %v955_v45  ;;  %2925 = vmatprep.subr.bf16.mxu1 %v3224_v15 }
 0xafc   :  { %2920 = vmatmul.mubr.msk.bf16.vlgmr.msra.gmra.mrb[32].mxu0 %vm145_vm2, %v957_v8 }
 0xafd   :  { %2939 = vmatprep.mubr.msk.bf16.mxu0 %vm3225_vm1, %v3224_v15  ;;  %2926 = vmatpush3.bf16.msra.mxu1 %v3103_v42 }
 0xafe   :  { %2943 = vmatprep.subr.bf16.mxu1 %v3224_v15  ;;  %2932 = vmatpush3.bf16.msra.mxu0 %v3104_v43 }
 0xaff   :  { %2933 = vmatprep.subr.bf16.mxu0 %v3224_v15 }
 0xb02   :  { %2934 = vmatpush3.bf16.msra.mxu0 %v3105_v44 }
 0xb03   :  { %2935 = vmatprep.subr.bf16.mxu0 %v3224_v15 }
 0xb06   :  { %2936 = vmatpush3.bf16.msra.mxu0 %v3106_v63 }
 0xb07   :  { %2937 = vmatprep.subr.bf16.mxu0 %v3224_v15 }
 0xb0a   :  { %2938 = vmatpush3.bf16.msra.mxu0 %v3107_v2 }
 0xb0b   :  { %2957 = vmatprep.subr.bf16.mxu0 %v3224_v15 }
 0xbcb   :  { %v1000_v9 = vpop.f32.mrb[28].mxu1 }
 0xbcc   :  { %1056 = vrot.lane.b32.xlu0 %v1000_v9, %s3239_s27  ;;  %v2915_v10 = vpop.f32.mrb[29].mxu1 }
 0xbcd   :  { %v1003_v11 = vpop.f32.mrb[30].mxu1 }
 0xbce   :  { %v2916_v12 = vpop.f32.mrb[31].mxu1 }
 0xbcf   :  { %v1048_v13 = vpop.f32.mrb[32].mxu0 }
 0xbd0   :  { %1058 = vrot.lane.b32.xlu1 %v1048_v13, %s3239_s27  ;;  %v2921_v14 = vpop.f32.mrb[33].mxu0  ;;  %v1256_v13 = vsub.s32 2, %v3318_v24 }
 0xbd1   :  { %v1051_v16 = vpop.f32.mrb[34].mxu0 }
 0xbd2   :  { %v2922_v17 = vpop.f32.mrb[35].mxu0  ;;  %v1257_v14 = vrot.slane %v3324_v26, %v1256_v13 }
 0xc3e   :  { %v1057_v18 = vpop.permute.xlu0 %1056 }
 0xc3f   :  { %1063 = vst.msk [vmem:[#allocation2] sm:$0xff] %vm1062_vm6, %v1057_v18 }
 0xc42   :  { %v1059_v19 = vpop.permute.xlu1 %1058 }
 0xc43   :  { %1064 = vst.msk [vmem:[#allocation2 + $0x8] sm:$0xff] %vm1062_vm6, %v1059_v19 }
 0xc46   :  { %v1065_v20 = vld [vmem:[#allocation2] sm:$0xff] }
 0xc47   :  { %v3508_v21 = vadd.f32 %v1065_v20, %v3289_v0 }
 0xc49   :  { %v1069_v22 = vsel %vm35_vm0, %v3508_v21, 0.0 }
 0xc4a   :  { %1070 = vadd.xlane.f32.xlu0 %v1069_v22  ;;  %v1066_v23 = vld [vmem:[#allocation2 + $0x8] sm:$0xff] }
 0xc4b   :  { %v3513_v27 = vadd.f32 %v1066_v23, %v3294_v1 }
 0xc4d   :  { %v1072_v28 = vsel %vm35_vm0, %v3513_v27, 0.0 }
 0xc4e   :  { %1073 = vadd.xlane.f32.xlu1 %v1072_v28 }
 0xcd7   :  { %v1071_v31 = vpop.xlane.xlu0 %1070 }
 0xcd8   :  { %v1075_v32 = vmul.f32 0.03125, %v1071_v31 }
 0xcda   :  { %v1077_v33 = vsub.f32 %v3508_v21, %v1075_v32 }
 0xcdb   :  { %v1074_v35 = vpop.xlane.xlu1 %1073 }
 0xcdc   :  { %v1076_v36 = vmul.f32 0.03125, %v1074_v35  ;;  %v1079_v0 = vmul.f32 %v1077_v33, %v1077_v33 }
 0xcde   :  { %v1078_v37 = vsub.f32 %v3513_v27, %v1076_v36  ;;  %v1081_v38 = vsel %vm35_vm0, %v1079_v0, 0.0 }
 0xcdf   :  { %1082 = vadd.xlane.f32.xlu0 %v1081_v38 }
 0xce0   :  { %v1080_v40 = vmul.f32 %v1078_v37, %v1078_v37 }
 0xce2   :  { %v1084_v1 = vsel %vm35_vm0, %v1080_v40, 0.0 }
 0xce3   :  { %1085 = vadd.xlane.f32.xlu0 %v1084_v1  ;;  %v3108_v1 = vld [vmem:[%s3865_s1 + $0x10] sm:$0xff]  }
 0xd6c   :  { %v1083_v46 = vpop.xlane.xlu0 %1082 }
 0xd6d   :  { %v1087_v47 = vmul.f32 0.03125, %v1083_v46 }
 0xd6f   :  { %v1089_v49 = vadd.f32 1e-05, %v1087_v47 }
 0xd70   :  { %v1086_v50 = vpop.xlane.xlu0 %1085 }
 0xd71   :  { %3156 = vrsqrt.f32 %v1089_v49  ;;  %v1088_v51 = vmul.f32 0.03125, %v1086_v50  ;;  %v3593_v50 = vld [vmem:[%s3868_s4 + $0x8] sm:$0x7f] }
 0xd73   :  { %v1090_v52 = vadd.f32 1e-05, %v1088_v51  ;;  %v1289_v51 = vrot.slane %v3593_v50, %v65_v25  ;;  %v1307_v25 = vrot.slane %v3593_v50, %v3337_v39 }
 0xd75   :  { %3158 = vrsqrt.f32 %v1090_v52 }
 0xd7b   :  { %v3157_v54 = vpop.eup %3156 }
 0xd7c   :  { %v1093_v48 = vmul.f32 %v3157_v54, %v1077_v33 }
 0xd7e   :  { %v1099_v56 = vmul.f32 %v1098_v55, %v1093_v48  ;;  %v1295_v48 = vrot.slane %v3593_v50, %v71_v30 }
 0xd7f   :  { %v3159_v34 = vpop.eup %3158 }
 0xd80   :  { %v1094_v57 = vmul.f32 %v3159_v34, %v1078_v37  ;;  %v1105_v60 = vadd.f32 %v1104_v58, %v1099_v56 }
 0xd82   :  { %v1100_v59 = vmul.f32 %v1098_v55, %v1094_v57 }
 0xd84   :  { %v1106_v61 = vadd.f32 %v1104_v58, %v1100_v59 }
 0xd86   :  { %v1111_v62 = vpack.c.bf16 %v1106_v61, %v1105_v60 }
 0xd88   :  { %2928 = vmatmul.mubr.msk.bf16.vlgmr.msra.gmra.mrb[32].mxu1 %vm35_vm0, %v1111_v62 }
 0xd89   :  { %2947 = vmatprep.mubr.msk.bf16.mxu1 %vm3225_vm1, %v3224_v15  ;;  %2944 = vmatpush3.bf16.msra.mxu1 %v3108_v1 }
 0xd8a   :  { %2945 = vmatprep.subr.bf16.mxu1 %v3224_v15 }
 0xd8d   :  { %2946 = vmatpush3.bf16.msra.mxu1 %v3109_v41 }
 0xd8e   :  { %2951 = vmatprep.subr.bf16.mxu1 %v3224_v15 }
 0xe5b   :  { %v1165_v5 = vpop.f32.mrb[32].mxu1 }
 0xe5c   :  { %v1166_v6 = vadd.f32 %v1165_v5, %v1115_v4  ;;  %v2929_v7 = vpop.f32.mrb[33].mxu1 }
 0xe5d   :  { %v1168_v45 = vpop.f32.mrb[34].mxu1 }
 0xe5e   :  { %v1169_v8 = vadd.f32 %v1168_v45, %v1115_v4  ;;  %v2930_v9 = vpop.f32.mrb[35].mxu1  ;;  %v1172_v10 = vmax.f32 %v1166_v6, 0.0 }
 0xe60   :  { %v1173_v11 = vmax.f32 %v1169_v8, 0.0 }
 0xe62   :  { %v1182_v12 = vpack.c.bf16 %v1173_v11, %v1172_v10 }
 0xe64   :  { %2940 = vmatmul.mubr.msk.bf16.vlgmr.msra.gmra.mrb[36].mxu0 %vm1207_vm7, %v1182_v12 }
 0xe65   :  { %2959 = vmatprep.mubr.msk.bf16.mxu0 %vm3225_vm1, %v3224_v15 }
 0xf37   :  { %v1245_v16 = vpop.f32.mrb[36].mxu0 }
 0xf38   :  { %v1252_v17 = vadd.f32 %v1245_v16, %v3508_v21  ;;  %v2941_v18 = vpop.f32.mrb[37].mxu0 }
 0xf39   :  { %v1248_v19 = vpop.f32.mrb[38].mxu0 }
 0xf3a   :  { %v3569_v20 = vadd.f32 %v1257_v14, %v1252_v17  ;;  %v1253_v22 = vadd.f32 %v1248_v19, %v3513_v27  ;;  %v2942_v23 = vpop.f32.mrb[39].mxu0 }
 0xf3c   :  { %v3572_v28 = vadd.f32 %v1257_v14, %v1253_v22  ;;  %v1260_v31 = vsel %vm35_vm0, %v3569_v20, 0.0 }
 0xf3d   :  { %1261 = vadd.xlane.f32.xlu0 %v1260_v31 }
 0xf3e   :  { %v1263_v32 = vsel %vm35_vm0, %v3572_v28, 0.0 }
 0xf3f   :  { %1264 = vadd.xlane.f32.xlu1 %v1263_v32 }
 0xfca   :  { %v1262_v26 = vpop.xlane.xlu0 %1261 }
 0xfcb   :  { %v1266_v33 = vmul.f32 0.03125, %v1262_v26 }
 0xfcc   :  { %v1265_v21 = vpop.xlane.xlu1 %1264 }
 0xfcd   :  { %v1268_v35 = vsub.f32 %v3569_v20, %v1266_v33  ;;  %v1267_v36 = vmul.f32 0.03125, %v1265_v21 }
 0xfcf   :  { %v1269_v0 = vsub.f32 %v3572_v28, %v1267_v36  ;;  %v1270_v27 = vmul.f32 %v1268_v35, %v1268_v35 }
 0xfd1   :  { %v1272_v37 = vsel %vm35_vm0, %v1270_v27, 0.0  ;;  %v1271_v38 = vmul.f32 %v1269_v0, %v1269_v0 }
 0xfd2   :  { %1273 = vadd.xlane.f32.xlu0 %v1272_v37 }
 0xfd3   :  { %v1275_v40 = vsel %vm35_vm0, %v1271_v38, 0.0 }
 0xfd4   :  { %1276 = vadd.xlane.f32.xlu1 %v1275_v40 }
0x105f   :  { %v1274_v42 = vpop.xlane.xlu0 %1273 }
0x1060   :  { %v1278_v43 = vmul.f32 0.03125, %v1274_v42 }
0x1061   :  { %v1277_v44 = vpop.xlane.xlu1 %1276 }
0x1062   :  { %v1280_v46 = vadd.f32 1e-05, %v1278_v43  ;;  %v1279_v47 = vmul.f32 0.03125, %v1277_v44 }
0x1064   :  { %3160 = vrsqrt.f32 %v1280_v46  ;;  %v1281_v49 = vadd.f32 1e-05, %v1279_v47 }
0x1066   :  { %3162 = vrsqrt.f32 %v1281_v49 }
0x106e   :  { %v3161_v52 = vpop.eup %3160 }
0x106f   :  { %v1284_v54 = vmul.f32 %v3161_v52, %v1268_v35 }
0x1070   :  { %v3163_v55 = vpop.eup %3162 }
0x1071   :  { %v1290_v34 = vmul.f32 %v1289_v51, %v1284_v54  ;;  %v1285_v56 = vmul.f32 %v3163_v55, %v1269_v0 }
0x1073   :  { %v1291_v57 = vmul.f32 %v1289_v51, %v1285_v56  ;;  %v1296_v58 = vadd.f32 %v1295_v48, %v1290_v34 }
0x1075   :  { %v1297_v59 = vadd.f32 %v1295_v48, %v1291_v57 }
0x1077   :  { %v1303_v60 = vpack.c.bf16 %v1297_v59, %v1296_v58 }
0x1079   :  { %2948 = vmatmul.mubr.msk.bf16.vlgmr.msra.gmra.mrb[36].mxu1 %vm35_vm0, %v1303_v60 }
0x107a   :  { %2953 = vmatprep.mubr.msk.bf16.mxu1 %vm3225_vm1, %v3224_v15 }
0x114c   :  { %v1357_v61 = vpop.f32.mrb[36].mxu1 }
0x114d   :  { %v1358_v62 = vadd.f32 %v1357_v61, %v1307_v25  ;;  %v2949_v63 = vpop.f32.mrb[37].mxu1 }
0x114e   :  { %v1360_v2 = vpop.f32.mrb[38].mxu1 }
0x114f   :  { %v3606_v4 = vpack.c.bf16 %v1358_v62, %v1358_v62  ;;  %v1361_v30 = vadd.f32 %v1360_v2, %v1307_v25  ;;  %v2950_v5 = vpop.f32.mrb[39].mxu1 }
0x1151   :  { %v3608_v6 = vpack.c.bf16 %v1361_v30, %v1361_v30  ;;  %1367 = vrot.lane.b32.xlu0 %v3606_v4, %s3226_s14 }
0x1153   :  { %1416 = vrot.lane.b32.xlu1 %v3608_v6, %s3226_s14 }
0x11c3   :  { %v1368_v7 = vpop.permute.xlu0 %1367 }
0x11c4   :  { %v1373_v45 = vsel %vm145_vm2, %v1368_v7, 0 }
0x11c5   :  { %2952 = vmatpush3.bf16.xpose.msra.mxu1 %v1373_v45  ;;  %v1417_v8 = vpop.permute.xlu1 %1416 }
0x11c6   :  { %v1422_v9 = vsel %vm145_vm2, %v1417_v8, 0  ;;  %2963 = vmatprep.subr.bf16.mxu1 %v3224_v15 }
0x11c7   :  { %2958 = vmatpush3.bf16.xpose.msra.mxu0 %v1422_v9 }
0x11c8   :  { %2969 = vmatprep.subr.bf16.mxu0 %v3224_v15 }
0x11cc   :  { %2954 = vmatmul.mubr.msk.bf16.vlgmr.msra.gmra.mrb[40].mxu1 %vm145_vm2, %v3606_v4 }
0x11cd   :  { %2965 = vmatprep.mubr.msk.bf16.mxu1 %vm3225_vm1, %v3224_v15 }
0x11ce   :  { %2960 = vmatmul.mubr.msk.bf16.vlgmr.msra.gmra.mrb[40].mxu0 %vm145_vm2, %v3608_v6 }
0x11cf   :  { %2971 = vmatprep.mubr.msk.bf16.mxu0 %vm3225_vm1, %v3224_v15 }
0x129f   :  { %v1409_v10 = vpop.f32.mrb[40].mxu1 }
0x12a0   :  { %v1464_v11 = vmul.f32 0.35355338, %v1409_v10  ;;  %v2955_v12 = vpop.f32.mrb[41].mxu1 }
0x12a1   :  { %v1412_v14 = vpop.f32.mrb[42].mxu1  ;;  %v1458_v16 = vpop.f32.mrb[40].mxu0 }
0x12a2   :  { %v1465_v17 = vmul.f32 0.35355338, %v1458_v16  ;;  %v2956_v18 = vpop.f32.mrb[43].mxu1  ;;  %v2961_v19 = vpop.f32.mrb[41].mxu0  ;;  %v1466_v22 = vsel %vm145_vm2, %v1464_v11, -inf }
0x12a3   :  { %1467 = vmax.xlane.f32.xlu1 %v1466_v22  ;;  %v1461_v23 = vpop.f32.mrb[42].mxu0 }
0x12a4   :  { %v2962_v31 = vpop.f32.mrb[43].mxu0  ;;  %v1469_v32 = vsel %vm145_vm2, %v1465_v17, -inf }
0x12a5   :  { %1470 = vmax.xlane.f32.xlu0 %v1469_v32 }
0x12b4   :  { %1538 = vrot.lane.b32.xlu1 %v3608_v6, %s3227_s15 }
0x12b8   :  { %1590 = vrot.lane.b32.xlu1 %v3606_v4, %s3228_s16 }
0x1330   :  { %v1468_v26 = vpop.xlane.xlu1 %1467 }
0x1331   :  { %v1472_v33 = vsub.f32 %v1464_v11, %v1468_v26 }
0x1332   :  { %v1471_v21 = vpop.xlane.xlu0 %1470 }
0x1333   :  { %v1474_v35 = vmul.f32 1.442695, %v1472_v33  ;;  %v1473_v36 = vsub.f32 %v1465_v17, %v1471_v21 }
0x1334   :  { %v1539_v0 = vpop.permute.xlu1 %1538 }
0x1335   :  { %3164 = vpow2.f32 %v1474_v35  ;;  %v1476_v27 = vmul.f32 1.442695, %v1473_v36  ;;  %v1544_v37 = vsel %vm272_vm3, %v1539_v0, 0 }
0x1336   :  { %2970 = vmatpush3.bf16.msra.mxu0 %v1544_v37 }
0x1337   :  { %3166 = vpow2.f32 %v1476_v27  ;;  %2981 = vmatprep.subr.bf16.mxu0 %v3224_v15 }
0x1338   :  { %v1591_v42 = vpop.permute.xlu1 %1590 }
0x1339   :  { %v1596_v34 = vsel %vm145_vm2, %v1591_v42, 0 }
0x133f   :  { %v3165_v38 = vpop.eup %3164 }
0x1340   :  { %v1478_v40 = vsel %vm145_vm2, %v3165_v38, 0.0 }
0x1341   :  { %v3167_v1 = vpop.eup %3166  ;;  %1479 = vadd.xlane.f32.xlu0 %v1478_v40 }
0x1342   :  { %v1481_v41 = vsel %vm145_vm2, %v3167_v1, 0.0 }
0x1343   :  { %1482 = vadd.xlane.f32.xlu1 %v1481_v41 }
0x1354   :  { %1640 = vrot.lane.b32.xlu1 %v3608_v6, %s3228_s16 }
0x1357   :  { %1490 = vrot.lane.b32.xlu0 %v3606_v4, %s3227_s15 }
0x1358   :  { %1638 = vrot.lane.b32.xlu1 %v3608_v6, %s3229_s17 }
0x135b   :  { %1588 = vrot.lane.b32.xlu0 %v3606_v4, %s3229_s17 }
0x13ce   :  { %v1480_v43 = vpop.xlane.xlu0 %1479 }
0x13cf   :  { %3168 = vrcp.f32 %v1480_v43 }
0x13d0   :  { %v1483_v44 = vpop.xlane.xlu1 %1482 }
0x13d1   :  { %3170 = vrcp.f32 %v1483_v44 }
0x13d2   :  { %v1491_v46 = vpop.permute.xlu0 %1490 }
0x13d3   :  { %v1496_v47 = vsel %vm272_vm3, %v1491_v46, 0 }
0x13d4   :  { %2964 = vmatpush3.bf16.msra.mxu1 %v1496_v47  ;;  %v1641_v48 = vpop.permute.xlu1 %1640 }
0x13d5   :  { %2975 = vmatprep.subr.bf16.mxu1 %v3224_v15  ;;  %v1646_v57 = vsel %vm145_vm2, %v1641_v48, 0 }
0x13d6   :  { %v1589_v58 = vpop.permute.xlu0 %1588 }
0x13d8   :  { %v1639_v59 = vpop.permute.xlu1 %1638 }
0x13d9   :  { %v3169_v49 = vpop.eup %3168 }
0x13da   :  { %v1486_v51 = vmul.f32 %v3169_v49, %v3165_v38 }
0x13db   :  { %v3171_v52 = vpop.eup %3170 }
0x13dc   :  { %v1487_v54 = vmul.f32 %v3171_v52, %v3167_v1  ;;  %v1488_v55 = vpack.c.bf16 %v1486_v51, %v1486_v51 }
0x13de   :  { %2966 = vmatmul.mubr.msk.bf16.vlgmr.msra.gmra.mrb[44].mxu1 %vm145_vm2, %v1488_v55  ;;  %v1489_v56 = vpack.c.bf16 %v1487_v54, %v1487_v54 }
0x13df   :  { %2976 = vmatpush3.bf16.xpose.msra.mxu1 %v1596_v34  ;;  %2977 = vmatprep.mubr.msk.bf16.mxu1 %vm3225_vm1, %v3224_v15 }
0x13e0   :  { %2972 = vmatmul.mubr.msk.bf16.vlgmr.msra.gmra.mrb[44].mxu0 %vm145_vm2, %v1489_v56  ;;  %2987 = vmatprep.subr.bf16.mxu1 %v3224_v15 }
0x13e1   :  { %2982 = vmatpush3.bf16.xpose.msra.mxu0 %v1646_v57  ;;  %2983 = vmatprep.mubr.msk.bf16.mxu0 %vm3225_vm1, %v3224_v15 }
0x13e2   :  { %2993 = vmatprep.subr.bf16.mxu0 %v3224_v15 }
0x13e6   :  { %2978 = vmatmul.mubr.msk.bf16.vlgmr.msra.gmra.mrb[48].mxu1 %vm145_vm2, %v1589_v58 }
0x13e7   :  { %2989 = vmatprep.mubr.msk.bf16.mxu1 %vm3225_vm1, %v3224_v15 }
0x13e8   :  { %2984 = vmatmul.mubr.msk.bf16.vlgmr.msra.gmra.mrb[48].mxu0 %vm145_vm2, %v1639_v59 }
0x13e9   :  { %2995 = vmatprep.mubr.msk.bf16.mxu0 %vm3225_vm1, %v3224_v15 }
0x14b1   :  { %v1532_v60 = vpop.f32.mrb[44].mxu1 }
0x14b2   :  { %1586 = vst.msk [vmem:[#allocation2] sm:$0xff] %vm145_vm2, %v1532_v60  ;;  %v2967_v25 = vpop.f32.mrb[45].mxu1 }
0x14b3   :  { %v1535_v61 = vpop.f32.mrb[46].mxu1  ;;  %v1580_v62 = vpop.f32.mrb[44].mxu0 }
0x14b4   :  { %1587 = vst.msk [vmem:[#allocation2 + $0x8] sm:$0xff] %vm145_vm2, %v1580_v62  ;;  %v2968_v63 = vpop.f32.mrb[47].mxu1  ;;  %v2973_v2 = vpop.f32.mrb[45].mxu0 }
0x14b5   :  { %v1583_v30 = vpop.f32.mrb[46].mxu0 }
0x14b6   :  { %v2974_v5 = vpop.f32.mrb[47].mxu0 }
0x14b9   :  { %v1632_v7 = vpop.f32.mrb[48].mxu1 }
0x14ba   :  { %v1688_v45 = vmul.f32 0.35355338, %v1632_v7  ;;  %v2979_v8 = vpop.f32.mrb[49].mxu1 }
0x14bb   :  { %v1635_v9 = vpop.f32.mrb[50].mxu1  ;;  %v1682_v10 = vpop.f32.mrb[48].mxu0 }
0x14bc   :  { %v1689_v11 = vmul.f32 0.35355338, %v1682_v10  ;;  %v2980_v12 = vpop.f32.mrb[51].mxu1  ;;  %v2985_v14 = vpop.f32.mrb[49].mxu0  ;;  %v1690_v16 = vsel %vm145_vm2, %v1688_v45, -inf }
0x14bd   :  { %1691 = vmax.xlane.f32.xlu0 %v1690_v16  ;;  %v1685_v17 = vpop.f32.mrb[50].mxu0 }
0x14be   :  { %v2986_v18 = vpop.f32.mrb[51].mxu0  ;;  %v1693_v19 = vsel %vm145_vm2, %v1689_v11, -inf }
0x14bf   :  { %1694 = vmax.xlane.f32.xlu1 %v1693_v19 }
0x14d0   :  { %1762 = vrot.lane.b32.xlu1 %v3608_v6, %s3230_s18 }
0x14d4   :  { %1822 = vrot.lane.b32.xlu1 %v3606_v4, %s3231_s19 }
0x14d8   :  { %1872 = vrot.lane.b32.xlu1 %v3608_v6, %s3231_s19 }
0x14dc   :  { %1870 = vrot.lane.b32.xlu1 %v3608_v6, %s3232_s20 }
0x154a   :  { %v1692_v22 = vpop.xlane.xlu0 %1691 }
0x154b   :  { %v1696_v23 = vsub.f32 %v1688_v45, %v1692_v22 }
0x154c   :  { %v1695_v31 = vpop.xlane.xlu1 %1694 }
0x154d   :  { %v1698_v32 = vmul.f32 1.442695, %v1696_v23  ;;  %v1697_v26 = vsub.f32 %v1689_v11, %v1695_v31 }
0x154f   :  { %3172 = vpow2.f32 %v1698_v32  ;;  %v1700_v33 = vmul.f32 1.442695, %v1697_v26 }
0x1550   :  { %v1763_v21 = vpop.permute.xlu1 %1762 }
0x1551   :  { %3174 = vpow2.f32 %v1700_v33  ;;  %v1768_v35 = vsel %vm272_vm3, %v1763_v21, 0 }
0x1552   :  { %2994 = vmatpush3.bf16.msra.mxu0 %v1768_v35 }
0x1553   :  { %3005 = vmatprep.subr.bf16.mxu0 %v3224_v15 }
0x1554   :  { %v1823_v43 = vpop.permute.xlu1 %1822 }
0x1555   :  { %v1828_v52 = vsel %vm145_vm2, %v1823_v43, 0 }
0x1558   :  { %v1873_v51 = vpop.permute.xlu1 %1872 }
0x1559   :  { %v3173_v36 = vpop.eup %3172  ;;  %v1878_v55 = vsel %vm145_vm2, %v1873_v51, 0 }
0x155a   :  { %v1702_v0 = vsel %vm145_vm2, %v3173_v36, 0.0 }
0x155b   :  { %v3175_v27 = vpop.eup %3174  ;;  %1703 = vadd.xlane.f32.xlu0 %v1702_v0 }
0x155c   :  { %v1705_v37 = vsel %vm145_vm2, %v3175_v27, 0.0  ;;  %v1871_v34 = vpop.permute.xlu1 %1870 }
0x155f   :  { %1706 = vadd.xlane.f32.xlu0 %v1705_v37 }
0x1575   :  { %1714 = vrot.lane.b32.xlu0 %v3606_v4, %s3230_s18 }
0x1579   :  { %1820 = vrot.lane.b32.xlu0 %v3606_v4, %s3232_s20 }
0x15e8   :  { %v1704_v38 = vpop.xlane.xlu0 %1703 }
0x15e9   :  { %3176 = vrcp.f32 %v1704_v38 }
0x15ec   :  { %v1707_v40 = vpop.xlane.xlu0 %1706 }
0x15ed   :  { %3178 = vrcp.f32 %v1707_v40 }
0x15f0   :  { %v1715_v1 = vpop.permute.xlu0 %1714 }
0x15f1   :  { %v1720_v41 = vsel %vm272_vm3, %v1715_v1, 0 }
0x15f2   :  { %2988 = vmatpush3.bf16.msra.mxu1 %v1720_v41 }
0x15f3   :  { %v3177_v42 = vpop.eup %3176  ;;  %2999 = vmatprep.subr.bf16.mxu1 %v3224_v15 }
0x15f4   :  { %v1710_v44 = vmul.f32 %v3177_v42, %v3173_v36  ;;  %v1821_v48 = vpop.permute.xlu0 %1820 }
0x15f6   :  { %v1712_v46 = vpack.c.bf16 %v1710_v44, %v1710_v44 }
0x15f7   :  { %v3179_v47 = vpop.eup %3178 }
0x15f8   :  { %v1711_v49 = vmul.f32 %v3179_v47, %v3175_v27  ;;  %2990 = vmatmul.mubr.msk.bf16.vlgmr.msra.gmra.mrb[52].mxu1 %vm145_vm2, %v1712_v46 }
0x15f9   :  { %3001 = vmatprep.mubr.msk.bf16.mxu1 %vm3225_vm1, %v3224_v15 }
0x15fa   :  { %v1713_v54 = vpack.c.bf16 %v1711_v49, %v1711_v49 }
0x15fb   :  { %3000 = vmatpush3.bf16.xpose.msra.mxu1 %v1828_v52 }
0x15fc   :  { %2996 = vmatmul.mubr.msk.bf16.vlgmr.msra.gmra.mrb[52].mxu0 %vm145_vm2, %v1713_v54  ;;  %3011 = vmatprep.subr.bf16.mxu1 %v3224_v15 }
0x15fd   :  { %3006 = vmatpush3.bf16.xpose.msra.mxu0 %v1878_v55  ;;  %3007 = vmatprep.mubr.msk.bf16.mxu0 %vm3225_vm1, %v3224_v15 }
0x15fe   :  { %3017 = vmatprep.subr.bf16.mxu0 %v3224_v15 }
0x1602   :  { %3002 = vmatmul.mubr.msk.bf16.vlgmr.msra.gmra.mrb[56].mxu1 %vm145_vm2, %v1821_v48 }
0x1603   :  { %3013 = vmatprep.mubr.msk.bf16.mxu1 %vm3225_vm1, %v3224_v15 }
0x1604   :  { %3008 = vmatmul.mubr.msk.bf16.vlgmr.msra.gmra.mrb[56].mxu0 %vm145_vm2, %v1871_v34 }
0x1605   :  { %3019 = vmatprep.mubr.msk.bf16.mxu0 %vm3225_vm1, %v3224_v15 }
0x16cb   :  { %v3700_v56 = vpop.f32.mrb[52].mxu1 }
0x16cc   :  { %v2991_v57 = vpop.f32.mrb[53].mxu1 }
0x16cd   :  { %v1759_v58 = vpop.f32.mrb[54].mxu1 }
0x16ce   :  { %v2992_v59 = vpop.f32.mrb[55].mxu1 }
0x16cf   :  { %v3702_v60 = vpop.f32.mrb[52].mxu0 }
0x16d0   :  { %v2997_v25 = vpop.f32.mrb[53].mxu0 }
0x16d1   :  { %v1807_v61 = vpop.f32.mrb[54].mxu0 }
0x16d2   :  { %v2998_v62 = vpop.f32.mrb[55].mxu0 }
0x16d5   :  { %v1864_v63 = vpop.f32.mrb[56].mxu1 }
0x16d6   :  { %v1920_v2 = vmul.f32 0.35355338, %v1864_v63  ;;  %v3003_v30 = vpop.f32.mrb[57].mxu1 }
0x16d7   :  { %v1867_v5 = vpop.f32.mrb[58].mxu1  ;;  %v1914_v7 = vpop.f32.mrb[56].mxu0 }
0x16d8   :  { %v1921_v45 = vmul.f32 0.35355338, %v1914_v7  ;;  %v3004_v8 = vpop.f32.mrb[59].mxu1  ;;  %v3009_v9 = vpop.f32.mrb[57].mxu0  ;;  %v1922_v10 = vsel %vm145_vm2, %v1920_v2, -inf }
0x16d9   :  { %1923 = vmax.xlane.f32.xlu0 %v1922_v10  ;;  %v1917_v11 = vpop.f32.mrb[58].mxu0 }
0x16da   :  { %v3010_v12 = vpop.f32.mrb[59].mxu0  ;;  %v1925_v14 = vsel %vm145_vm2, %v1921_v45, -inf }
0x16db   :  { %1926 = vmax.xlane.f32.xlu1 %v1925_v14 }
0x16ec   :  { %1994 = vrot.lane.b32.xlu1 %v3608_v6, %s3233_s21 }
0x16f0   :  { %2054 = vrot.lane.b32.xlu1 %v3606_v4, %s3234_s22 }
0x16f4   :  { %2104 = vrot.lane.b32.xlu1 %v3608_v6, %s3234_s22 }
0x16f8   :  { %2102 = vrot.lane.b32.xlu1 %v3608_v6, %s3235_s23 }
0x1766   :  { %v1924_v16 = vpop.xlane.xlu0 %1923 }
0x1767   :  { %v1928_v17 = vsub.f32 %v1920_v2, %v1924_v16 }
0x1768   :  { %v1927_v18 = vpop.xlane.xlu1 %1926 }
0x1769   :  { %v1930_v19 = vmul.f32 1.442695, %v1928_v17  ;;  %v1929_v22 = vsub.f32 %v1921_v45, %v1927_v18 }
0x176b   :  { %3180 = vpow2.f32 %v1930_v19  ;;  %v1932_v23 = vmul.f32 1.442695, %v1929_v22 }
0x176c   :  { %v1995_v31 = vpop.permute.xlu1 %1994 }
0x176d   :  { %3182 = vpow2.f32 %v1932_v23  ;;  %v2000_v32 = vsel %vm272_vm3, %v1995_v31, 0 }
0x176e   :  { %3018 = vmatpush3.bf16.msra.mxu0 %v2000_v32 }
0x176f   :  { %3029 = vmatprep.subr.bf16.mxu0 %v3224_v15 }
0x1770   :  { %v2055_v40 = vpop.permute.xlu1 %2054 }
0x1771   :  { %v2060_v46 = vsel %vm145_vm2, %v2055_v40, 0 }
0x1774   :  { %v2105_v44 = vpop.permute.xlu1 %2104 }
0x1775   :  { %v3181_v26 = vpop.eup %3180  ;;  %v2110_v49 = vsel %vm145_vm2, %v2105_v44, 0 }
0x1776   :  { %v1934_v33 = vsel %vm145_vm2, %v3181_v26, 0.0 }
0x1777   :  { %v3183_v21 = vpop.eup %3182  ;;  %1935 = vadd.xlane.f32.xlu0 %v1934_v33 }
0x1778   :  { %v1937_v35 = vsel %vm145_vm2, %v3183_v21, 0.0  ;;  %v2103_v52 = vpop.permute.xlu1 %2102 }
0x177b   :  { %1938 = vadd.xlane.f32.xlu0 %v1937_v35 }
0x1791   :  { %1946 = vrot.lane.b32.xlu0 %v3606_v4, %s3233_s21 }
0x1795   :  { %2052 = vrot.lane.b32.xlu0 %v3606_v4, %s3235_s23 }
0x1804   :  { %v1936_v36 = vpop.xlane.xlu0 %1935 }
0x1805   :  { %3184 = vrcp.f32 %v1936_v36 }
0x1808   :  { %v1939_v0 = vpop.xlane.xlu0 %1938 }
0x1809   :  { %3186 = vrcp.f32 %v1939_v0 }
0x180c   :  { %v1947_v27 = vpop.permute.xlu0 %1946 }
0x180d   :  { %v1952_v37 = vsel %vm272_vm3, %v1947_v27, 0 }
0x180e   :  { %3012 = vmatpush3.bf16.msra.mxu1 %v1952_v37 }
0x180f   :  { %v3185_v38 = vpop.eup %3184  ;;  %3023 = vmatprep.subr.bf16.mxu1 %v3224_v15 }
0x1810   :  { %v1942_v1 = vmul.f32 %v3185_v38, %v3181_v26  ;;  %v2053_v51 = vpop.permute.xlu0 %2052 }
0x1812   :  { %v1944_v41 = vpack.c.bf16 %v1942_v1, %v1942_v1 }
0x1813   :  { %v3187_v42 = vpop.eup %3186 }
0x1814   :  { %v1943_v43 = vmul.f32 %v3187_v42, %v3183_v21  ;;  %3014 = vmatmul.mubr.msk.bf16.vlgmr.msra.gmra.mrb[60].mxu1 %vm145_vm2, %v1944_v41 }
0x1815   :  { %3025 = vmatprep.mubr.msk.bf16.mxu1 %vm3225_vm1, %v3224_v15 }
0x1816   :  { %v1945_v47 = vpack.c.bf16 %v1943_v43, %v1943_v43 }
0x1817   :  { %3024 = vmatpush3.bf16.xpose.msra.mxu1 %v2060_v46 }
0x1818   :  { %3020 = vmatmul.mubr.msk.bf16.vlgmr.msra.gmra.mrb[60].mxu0 %vm145_vm2, %v1945_v47  ;;  %3035 = vmatprep.subr.bf16.mxu1 %v3224_v15 }
0x1819   :  { %3030 = vmatpush3.bf16.xpose.msra.mxu0 %v2110_v49  ;;  %3031 = vmatprep.mubr.msk.bf16.mxu0 %vm3225_vm1, %v3224_v15 }
0x181a   :  { %3041 = vmatprep.subr.bf16.mxu0 %v3224_v15 }
0x181e   :  { %3026 = vmatmul.mubr.msk.bf16.vlgmr.msra.gmra.mrb[64].mxu1 %vm145_vm2, %v2053_v51 }
0x181f   :  { %3037 = vmatprep.mubr.msk.bf16.mxu1 %vm3225_vm1, %v3224_v15 }
0x1820   :  { %3032 = vmatmul.mubr.msk.bf16.vlgmr.msra.gmra.mrb[64].mxu0 %vm145_vm2, %v2103_v52 }
0x1821   :  { %3043 = vmatprep.mubr.msk.bf16.mxu0 %vm3225_vm1, %v3224_v15 }
0x18e7   :  { %v1988_v54 = vpop.f32.mrb[60].mxu1 }
0x18e8   :  { %v3015_v55 = vpop.f32.mrb[61].mxu1 }
0x18e9   :  { %v1991_v48 = vpop.f32.mrb[62].mxu1 }
0x18ea   :  { %v3016_v34 = vpop.f32.mrb[63].mxu1 }
0x18eb   :  { %v2036_v57 = vpop.f32.mrb[60].mxu0 }
0x18ec   :  { %v3021_v58 = vpop.f32.mrb[61].mxu0 }
0x18ed   :  { %v2039_v59 = vpop.f32.mrb[62].mxu0 }
0x18ee   :  { %v3022_v25 = vpop.f32.mrb[63].mxu0 }
0x18f1   :  { %v2096_v61 = vpop.f32.mrb[64].mxu1 }
0x18f2   :  { %v2152_v62 = vmul.f32 0.35355338, %v2096_v61  ;;  %v3027_v63 = vpop.f32.mrb[65].mxu1 }
0x18f3   :  { %v2099_v2 = vpop.f32.mrb[66].mxu1  ;;  %v2146_v30 = vpop.f32.mrb[64].mxu0 }
0x18f4   :  { %v2153_v5 = vmul.f32 0.35355338, %v2146_v30  ;;  %v3028_v7 = vpop.f32.mrb[67].mxu1  ;;  %v3033_v45 = vpop.f32.mrb[65].mxu0  ;;  %v2154_v8 = vsel %vm145_vm2, %v2152_v62, -inf }
0x18f5   :  { %2155 = vmax.xlane.f32.xlu0 %v2154_v8  ;;  %v2149_v9 = vpop.f32.mrb[66].mxu0  ;;  %v3110_v8 = vld [vmem:[%s3866_s2 + $0x10] sm:$0xff]  }
0x18f6   :  { %v3034_v10 = vpop.f32.mrb[67].mxu0  ;;  %v2157_v11 = vsel %vm145_vm2, %v2153_v5, -inf  ;;  %v3111_v9 = vld [vmem:[%s3866_s2 + $0x18] sm:$0xff]  }
0x18f7   :  { %2158 = vmax.xlane.f32.xlu1 %v2157_v11  ;;  %v3112_v10 = vld [vmem:[%s3867_s3 + $0x20] sm:$0xff]   ;;  %v3113_v11 = vld [vmem:[%s3867_s3 + $0x28] sm:$0xff]  }
0x1908   :  { %2226 = vrot.lane.b32.xlu1 %v3608_v6, %s3236_s24 }
0x190c   :  { %1812 = vrot.lane.b32.xlu1 %v3700_v56, %s3237_s25 }
0x1910   :  { %1814 = vrot.lane.b32.xlu1 %v3702_v60, %s3237_s25 }
0x1914   :  { %2046 = vrot.lane.b32.xlu1 %v2036_v57, %s3238_s26 }
0x1982   :  { %v2156_v12 = vpop.xlane.xlu0 %2155 }
0x1983   :  { %v2160_v14 = vsub.f32 %v2152_v62, %v2156_v12 }
0x1984   :  { %v2159_v16 = vpop.xlane.xlu1 %2158 }
0x1985   :  { %v2162_v17 = vmul.f32 1.442695, %v2160_v14  ;;  %v2161_v18 = vsub.f32 %v2153_v5, %v2159_v16 }
0x1987   :  { %3188 = vpow2.f32 %v2162_v17  ;;  %v2164_v19 = vmul.f32 1.442695, %v2161_v18 }
0x1988   :  { %v2227_v22 = vpop.permute.xlu1 %2226 }
0x1989   :  { %3190 = vpow2.f32 %v2164_v19  ;;  %v2232_v23 = vsel %vm272_vm3, %v2227_v22, 0 }
0x198a   :  { %3042 = vmatpush3.bf16.msra.mxu0 %v2232_v23  ;;  %v2317_v23 = vrot.slane %v3593_v50, %v1097_v53  ;;  %v3114_v53 = vld [vmem:[%s3867_s3 + $0x30] sm:$0xff]  }
0x198b   :  { %3055 = vmatprep.subr.bf16.mxu0 %v3224_v15 }
0x198c   :  { %v1813_v6 = vpop.permute.xlu1 %1812 }
0x198d   :  { %1818 = vst.msk [vmem:[#allocation2] sm:$0xff] %vm596_vm4, %v1813_v6 }
0x1990   :  { %v1815_v56 = vpop.permute.xlu1 %1814 }
0x1991   :  { %v3189_v60 = vpop.eup %3188  ;;  %1819 = vst.msk [vmem:[#allocation2 + $0x8] sm:$0xff] %vm596_vm4, %v1815_v56 }
0x1992   :  { %v2166_v31 = vsel %vm145_vm2, %v3189_v60, 0.0 }
0x1993   :  { %v3191_v32 = vpop.eup %3190  ;;  %2167 = vadd.xlane.f32.xlu0 %v2166_v31 }
0x1994   :  { %v2047_v26 = vpop.permute.xlu1 %2046  ;;  %v2169_v33 = vsel %vm145_vm2, %v3191_v32, 0.0 }
0x1995   :  { %2051 = vst.msk [vmem:[#allocation2 + $0x8] sm:$0xff] %vm829_vm5, %v2047_v26 }
0x1997   :  { %2170 = vadd.xlane.f32.xlu0 %v2169_v33 }
0x19ad   :  { %2178 = vrot.lane.b32.xlu0 %v3606_v4, %s3236_s24 }
0x19b1   :  { %2044 = vrot.lane.b32.xlu0 %v1988_v54, %s3238_s26 }
0x1a20   :  { %v2168_v21 = vpop.xlane.xlu0 %2167 }
0x1a21   :  { %3192 = vrcp.f32 %v2168_v21 }
0x1a24   :  { %v2171_v35 = vpop.xlane.xlu0 %2170 }
0x1a25   :  { %3194 = vrcp.f32 %v2171_v35 }
0x1a28   :  { %v2179_v36 = vpop.permute.xlu0 %2178 }
0x1a29   :  { %v2184_v0 = vsel %vm272_vm3, %v2179_v36, 0  ;;  %v2335_v36 = vrot.slane %v3593_v50, %v3557_v3 }
0x1a2a   :  { %3036 = vmatpush3.bf16.msra.mxu1 %v2184_v0 }
0x1a2b   :  { %v3193_v27 = vpop.eup %3192  ;;  %3047 = vmatprep.subr.bf16.mxu1 %v3224_v15 }
0x1a2c   :  { %v2174_v37 = vmul.f32 %v3193_v27, %v3189_v60  ;;  %v2045_v38 = vpop.permute.xlu0 %2044 }
0x1a2d   :  { %2050 = vst.msk [vmem:[#allocation2] sm:$0xff] %vm829_vm5, %v2045_v38 }
0x1a2e   :  { %v2176_v40 = vpack.c.bf16 %v2174_v37, %v2174_v37 }
0x1a2f   :  { %v3195_v1 = vpop.eup %3194 }
0x1a30   :  { %v2175_v4 = vmul.f32 %v3195_v1, %v3191_v32  ;;  %3038 = vmatmul.mubr.msk.bf16.vlgmr.msra.gmra.mrb[68].mxu1 %vm145_vm2, %v2176_v40  ;;  %v2323_v32 = vrot.slane %v3593_v50, %v1103_v29  ;;  %v3115_v29 = vld [vmem:[%s3867_s3 + $0x38] sm:$0xff]  }
0x1a31   :  { %3051 = vmatprep.mubr.msk.bf16.mxu1 %vm3225_vm1, %v3224_v15  ;;  %3048 = vmatpush3.bf16.msra.mxu1 %v3110_v8 }
0x1a32   :  { %v2177_v41 = vpack.c.bf16 %v2175_v4, %v2175_v4  ;;  %3049 = vmatprep.subr.bf16.mxu1 %v3224_v15 }
0x1a34   :  { %3044 = vmatmul.mubr.msk.bf16.vlgmr.msra.gmra.mrb[68].mxu0 %vm145_vm2, %v2177_v41 }
0x1a35   :  { %3063 = vmatprep.mubr.msk.bf16.mxu0 %vm3225_vm1, %v3224_v15  ;;  %3050 = vmatpush3.bf16.msra.mxu1 %v3111_v9 }
0x1a36   :  { %3067 = vmatprep.subr.bf16.mxu1 %v3224_v15  ;;  %3056 = vmatpush3.bf16.msra.mxu0 %v3112_v10 }
0x1a37   :  { %3057 = vmatprep.subr.bf16.mxu0 %v3224_v15 }
0x1a3a   :  { %3058 = vmatpush3.bf16.msra.mxu0 %v3113_v11 }
0x1a3b   :  { %3059 = vmatprep.subr.bf16.mxu0 %v3224_v15 }
0x1a3e   :  { %3060 = vmatpush3.bf16.msra.mxu0 %v3114_v53 }
0x1a3f   :  { %3061 = vmatprep.subr.bf16.mxu0 %v3224_v15 }
0x1a42   :  { %3062 = vmatpush3.bf16.msra.mxu0 %v3115_v29 }
0x1b03   :  { %v2220_v42 = vpop.f32.mrb[68].mxu1 }
0x1b04   :  { %2276 = vrot.lane.b32.xlu0 %v2220_v42, %s3239_s27  ;;  %v3039_v43 = vpop.f32.mrb[69].mxu1 }
0x1b05   :  { %v2223_v44 = vpop.f32.mrb[70].mxu1  ;;  %v3116_v43 = vld [vmem:[%s3869_s5] sm:$0xff]  }
0x1b06   :  { %v3040_v46 = vpop.f32.mrb[71].mxu1  ;;  %v3117_v44 = vld [vmem:[%s3869_s5 + $0x8] sm:$0xff]  }
0x1b07   :  { %v2268_v47 = vpop.f32.mrb[68].mxu0  ;;  %v2477_v46 = vrot.slane %v3593_v50, %v1256_v13 }
0x1b08   :  { %2278 = vrot.lane.b32.xlu1 %v2268_v47, %s3239_s27  ;;  %v3045_v49 = vpop.f32.mrb[69].mxu0 }
0x1b09   :  { %v2271_v51 = vpop.f32.mrb[70].mxu0 }
0x1b0a   :  { %v3046_v52 = vpop.f32.mrb[71].mxu0 }
0x1b76   :  { %v2277_v54 = vpop.permute.xlu0 %2276 }
0x1b77   :  { %2282 = vst.msk [vmem:[#allocation2] sm:$0xff] %vm1062_vm6, %v2277_v54 }
0x1b7a   :  { %v2279_v55 = vpop.permute.xlu1 %2278 }
0x1b7b   :  { %2283 = vst.msk [vmem:[#allocation2 + $0x8] sm:$0xff] %vm1062_vm6, %v2279_v55 }
0x1b7e   :  { %v2284_v48 = vld [vmem:[#allocation2] sm:$0xff] }
0x1b7f   :  { %v3773_v34 = vadd.f32 %v2284_v48, %v3569_v20 }
0x1b81   :  { %v2288_v57 = vsel %vm35_vm0, %v3773_v34, 0.0 }
0x1b82   :  { %2289 = vadd.xlane.f32.xlu0 %v2288_v57  ;;  %v2285_v58 = vld [vmem:[#allocation2 + $0x8] sm:$0xff] }
0x1b83   :  { %v3778_v59 = vadd.f32 %v2285_v58, %v3572_v28 }
0x1b85   :  { %v2291_v25 = vsel %vm35_vm0, %v3778_v59, 0.0 }
0x1b86   :  { %2292 = vadd.xlane.f32.xlu1 %v2291_v25 }
0x1c0f   :  { %v2290_v61 = vpop.xlane.xlu0 %2289 }
0x1c10   :  { %v2294_v62 = vmul.f32 0.03125, %v2290_v61 }
0x1c12   :  { %v2296_v63 = vsub.f32 %v3773_v34, %v2294_v62 }
0x1c13   :  { %v2293_v2 = vpop.xlane.xlu1 %2292 }
0x1c14   :  { %v2295_v30 = vmul.f32 0.03125, %v2293_v2  ;;  %v2298_v20 = vmul.f32 %v2296_v63, %v2296_v63 }
0x1c16   :  { %v2297_v5 = vsub.f32 %v3778_v59, %v2295_v30  ;;  %v2300_v7 = vsel %vm35_vm0, %v2298_v20, 0.0 }
0x1c17   :  { %2301 = vadd.xlane.f32.xlu0 %v2300_v7 }
0x1c18   :  { %v2299_v45 = vmul.f32 %v2297_v5, %v2297_v5 }
0x1c1a   :  { %v2303_v28 = vsel %vm35_vm0, %v2299_v45, 0.0 }
0x1c1b   :  { %2304 = vadd.xlane.f32.xlu0 %v2303_v28 }
0x1ca4   :  { %v2302_v12 = vpop.xlane.xlu0 %2301 }
0x1ca5   :  { %v2306_v14 = vmul.f32 0.03125, %v2302_v12 }
0x1ca7   :  { %v2308_v16 = vadd.f32 1e-05, %v2306_v14  ;;  %v3118_v14 = vld [vmem:[%s3870_s6] sm:$0xff]  }
0x1ca8   :  { %v2305_v17 = vpop.xlane.xlu0 %2304 }
0x1ca9   :  { %3196 = vrsqrt.f32 %v2308_v16  ;;  %v2307_v18 = vmul.f32 0.03125, %v2305_v17  ;;  %v3119_v16 = vld [vmem:[%s3870_s6 + $0x8] sm:$0xff]   ;;  %v2497_v17 = vld [vmem:[%s3871_s7] sm:$0x3]  ;;  %s2643_s6 = sshll.u32 %s3240_s0, 4  ;;  %s2644_s6 = int_to_ptr.vmem [resolvable:$true] %s2643_s6 }
0x1caa   :  { %s3200_s7 = scalar_lea.vmem %s2644_s6, 32  ;;  %p3205_p1 = scmp.lt.s32.totalorder %s2644_s6, %s2644_s6 }
0x1cab   :  { %v2309_v19 = vadd.f32 1e-05, %v2307_v18  ;;  %v2507_v18 = vrot.slane %v2497_v17, %v3337_v39  ;;  %p3201_p0 = scmp.ne.s32.totalorder %s2644_s6, %s3200_s7  ;;  %p3206_p2 = scmp.lt.s32.totalorder %s3200_s7, %s3200_s7 }
0x1cad   :  { %3198 = vrsqrt.f32 %v2309_v19  ;;  %p3207_p3 = por %p3206_p2, %p3205_p1 }
0x1caf   :  { %p3208_p4 = pnand %p3207_p3, %p3201_p0 }
0x1cb3   :  { %v3197_v22 = vpop.eup %3196 }
0x1cb4   :  { %v2312_v6 = vmul.f32 %v3197_v22, %v2296_v63 }
0x1cb6   :  { %v2318_v60 = vmul.f32 %v2317_v23, %v2312_v6 }
0x1cb7   :  { %v3199_v56 = vpop.eup %3198 }
0x1cb8   :  { %v2313_v31 = vmul.f32 %v3199_v56, %v2297_v5  ;;  %v2324_v33 = vadd.f32 %v2323_v32, %v2318_v60 }
0x1cba   :  { %v2319_v26 = vmul.f32 %v2317_v23, %v2313_v31 }
0x1cbc   :  { %v2325_v21 = vadd.f32 %v2323_v32, %v2319_v26 }
0x1cbe   :  { %v2331_v35 = vpack.c.bf16 %v2325_v21, %v2324_v33 }
0x1cc0   :  { %3052 = vmatmul.mubr.msk.bf16.vlgmr.msra.gmra.mrb[72].mxu1 %vm35_vm0, %v2331_v35 }
0x1cc1   :  { %3071 = vmatprep.mubr.msk.bf16.mxu1 %vm3225_vm1, %v3224_v15  ;;  %3068 = vmatpush3.bf16.msra.mxu1 %v3116_v43 }
0x1cc2   :  { %3069 = vmatprep.subr.bf16.mxu1 %v3224_v15 }
0x1cc5   :  { %3070 = vmatpush3.bf16.msra.mxu1 %v3117_v44 }
0x1cc6   :  { %3075 = vmatprep.subr.bf16.mxu1 %v3224_v15 }
0x1d93   :  { %v2385_v0 = vpop.f32.mrb[72].mxu1 }
0x1d94   :  { %v2386_v27 = vadd.f32 %v2385_v0, %v2335_v36  ;;  %v3053_v37 = vpop.f32.mrb[73].mxu1 }
0x1d95   :  { %v2388_v38 = vpop.f32.mrb[74].mxu1 }
0x1d96   :  { %v2389_v40 = vadd.f32 %v2388_v38, %v2335_v36  ;;  %v3054_v1 = vpop.f32.mrb[75].mxu1  ;;  %v2392_v4 = vmax.f32 %v2386_v27, 0.0 }
0x1d98   :  { %v2393_v41 = vmax.f32 %v2389_v40, 0.0 }
0x1d9a   :  { %v2403_v42 = vpack.c.bf16 %v2393_v41, %v2392_v4 }
0x1d9c   :  { %3064 = vmatmul.mubr.msk.bf16.vlgmr.msra.gmra.mrb[72].mxu0 %vm1207_vm7, %v2403_v42 }
0x1e6f   :  { %v2465_v47 = vpop.f32.mrb[72].mxu0 }
0x1e70   :  { %v2472_v49 = vadd.f32 %v2465_v47, %v3773_v34  ;;  %v3065_v51 = vpop.f32.mrb[73].mxu0 }
0x1e71   :  { %v2468_v52 = vpop.f32.mrb[74].mxu0 }
0x1e72   :  { %v2478_v54 = vadd.f32 %v2477_v46, %v2472_v49  ;;  %v2473_v55 = vadd.f32 %v2468_v52, %v3778_v59  ;;  %v3066_v48 = vpop.f32.mrb[75].mxu0 }
0x1e74   :  { %v2480_v57 = vsel %vm35_vm0, %v2478_v54, 0.0  ;;  %v2479_v58 = vadd.f32 %v2477_v46, %v2473_v55 }
0x1e75   :  { %v2481_v25 = vrot.slane %v2480_v57, 4 }
0x1e76   :  { %v2487_v61 = vsel %vm35_vm0, %v2479_v58, 0.0 }
0x1e77   :  { %v2482_v62 = vadd.f32 %v2481_v25, %v2480_v57  ;;  %v2488_v63 = vrot.slane %v2487_v61, 4 }
0x1e79   :  { %v2483_v24 = vrot.slane %v2482_v62, 2  ;;  %v2489_v2 = vadd.f32 %v2488_v63, %v2487_v61 }
0x1e7b   :  { %v2484_v13 = vadd.f32 %v2483_v24, %v2482_v62  ;;  %v2490_v50 = vrot.slane %v2489_v2, 2 }
0x1e7d   :  { %v2485_v30 = vrot.slane %v2484_v13, 1  ;;  %v2491_v34 = vadd.f32 %v2490_v50, %v2489_v2 }
0x1e7f   :  { %v2486_v20 = vadd.f32 %v2485_v30, %v2484_v13  ;;  %v2492_v5 = vrot.slane %v2491_v34, 1 }
0x1e81   :  { %v2495_v7 = vmul.f32 0.125, %v2486_v20  ;;  %v2493_v45 = vadd.f32 %v2492_v5, %v2491_v34 }
0x1e83   :  { %v2502_v59 = vpack.c.bf16 %v2495_v7, %v2495_v7  ;;  %v2496_v28 = vmul.f32 0.125, %v2493_v45 }
0x1e85   :  { %v2503_v8 = vpack.c.bf16 %v2496_v28, %v2496_v28  ;;  %v2510_v9 = vunpack.c.l.b16 %v2502_v59 }
0x1e87   :  { %v2511_v10 = vunpack.c.l.b16 %v2503_v8 }
0x1e89   :  { %v2513_v11 = vsel %vm2512_vm8, %v2511_v10, %v2510_v9 }
0x1e8a   :  { %v2514_v12 = vpack.c.b16 %v2513_v11, %v2513_v11 }
0x1e8c   :  { %3072 = vmatmul.mubr.msk.bf16.vlgmr.msra.gmra.mrb[76].mxu1 %vm35_vm0, %v2514_v12 }
0x1e8d   :  { %3079 = vmatprep.mubr.msk.bf16.mxu1 %vm3225_vm1, %v3224_v15  ;;  %3076 = vmatpush3.bf16.msra.mxu1 %v3118_v14 }
0x1e8e   :  { %3077 = vmatprep.subr.bf16.mxu1 %v3224_v15  ;;  %v2579_v15 = vrot.slane %v2497_v17, %v3557_v3 }
0x1e91   :  { %3078 = vmatpush3.bf16.msra.mxu1 %v3119_v16 }
0x1f5f   :  { %v2564_v19 = vpop.f32.mrb[76].mxu1 }
0x1f60   :  { %v2565_v22 = vadd.f32 %v2564_v19, %v2507_v18  ;;  %v3073_v23 = vpop.f32.mrb[77].mxu1 }
0x1f61   :  { %v2567_v6 = vpop.f32.mrb[78].mxu1 }
0x1f62   :  { %v2570_v56 = vmax.f32 %v2565_v22, 0.0  ;;  %v3074_v60 = vpop.f32.mrb[79].mxu1 }
0x1f64   :  { %v2575_v31 = vpack.c.bf16 %v2570_v56, %v2570_v56 }
0x1f66   :  { %3080 = vmatmul.mubr.msk.bf16.vlgmr.msra.gmra.mrb[80].mxu1 %vm35_vm0, %v2575_v31 }
0x2039   :  { %v2629_v32 = vpop.f32.mrb[80].mxu1 }
0x203a   :  { %v2630_v26 = vadd.f32 %v2629_v32, %v2579_v15  ;;  %v3081_v33 = vpop.f32.mrb[81].mxu1 }
0x203b   :  { %v2632_v21 = vpop.f32.mrb[82].mxu1 }
0x203c   :  { %v3082_v39 = vpop.f32.mrb[83].mxu1  ;;  %2636 = vst.msk [vmem:[#allocation3] sm:$0x3] %vm2635_vm9, %v2630_v26 }
0x203d   :  { %3211 = shalt.err (!%p3208_p4)
}
0x203e   :  { %s3212_s11 = scalar_lea.hbm %s3872_s8, 32 }
0x203f   :  { %p3213_p5 = scmp.ne.s32.totalorder %s3872_s8, %s3212_s11  ;;  %p3216_p6 = scmp.lt.u32.totalorder %s3212_s11, %s3872_s8 }
0x2041   :  { %p3218_p7 = pnand %p3216_p6, %p3213_p5 }
0x2043   :  { %3221 = shalt.err (!%p3218_p7)
}
0x2044   :  { %2646 = dma.vmem_to_hbm [thread:$0]  %s2644_s6, 32, %s3872_s8, [#allocation4]  }
0x2045   :  { %3222 = dma.done.wait [#allocation4], 32  }
0x2046   :  { %3223 = vsyncadd [#allocation4], 4294967264 }
0x2047   :  { %2650 = vsyncpa [#allocation4], 1 }

</bundles_post_ra>
